<compile_context>
chip_gen: v5e
topology: v5e:2x2
jax: 0.10.0
libtpu: 0.0.40
codegen_flags: <defaults>
</compile_context>

<pallas_src>
import math
import functools

import jax
import jax.numpy as jnp
from jax.experimental import pallas as pl
from jax.experimental.pallas import tpu as pltpu


# ----------------------------------------------------------------------------
# GroupNorm group-count logic (mirrors the PyTorch GroupNorm subclass)
# ----------------------------------------------------------------------------
def _find_best_divisor(size, low, high, step=1):
    low = max(low, 1)  # guard: g//2 can be 0 for tiny channel counts
    _, best = min(((size % d, d) for d in range(low, high, step)))
    return best


def get_groups_count(num_channels, divider_coef=2):
    groups = math.sqrt(divider_coef * num_channels)
    g = divider_coef ** math.floor(math.log(groups) / math.log(divider_coef))
    if num_channels % g != 0:
        g = _find_best_divisor(num_channels, g // 2, g * 2)
    return g


# ----------------------------------------------------------------------------
# Hardware queries / tile budgeting
# ----------------------------------------------------------------------------
def _vmem_capacity_bytes():
    try:
        info = pltpu.get_tpu_info()
        for name in ("vmem_capacity_bytes", "vmem_bytes"):
            v = getattr(info, name, None)
            if v:
                return int(v)
    except Exception:
        pass
    return 64 << 20  # conservative fallback (v7x per-TensorCore)


def _num_tensorcores():
    try:
        info = pltpu.get_tpu_info()
        for name in ("num_cores", "core_count", "num_tensorcores"):
            v = getattr(info, name, None)
            if v:
                return int(v)
    except Exception:
        pass
    return 1  # single-TC default (v5e / v6e)


def _pick_batch_tile(n, hw, cin, cout, row_budget_bytes, min_steps):
    """Largest divisor B of n whose (B*hw)-row working set fits the VMEM budget,
    while keeping at least `min_steps` grid steps when n allows it."""
    # Per-row resident bytes: double-buffered bf16 in/out blocks + f32 working slabs
    # (h, identity, fused scale/bias temporaries) + bf16 recast before conv2.
    bytes_per_row = 4 * cin + 24 * cout
    max_rows = max(hw, row_budget_bytes // max(bytes_per_row, 1))  # B=1 always allowed
    best = 1
    for b in range(1, n + 1):
        if n % b:
            continue
        if b * hw > max_rows:
            continue
        if n >= min_steps and n // b < min_steps:
            continue
        best = b
    return best


def _const_spec(shape):
    # Grid-invariant operand: constant index_map -> DMA'd once, reused every step.
    return pl.BlockSpec(shape, lambda *_: (0,) * len(shape))


# ----------------------------------------------------------------------------
# Pallas kernel
# ----------------------------------------------------------------------------
def _basic_block_gn_kernel(x_ref, w1_ref, g1_ref, b1_ref, w2_ref, g2_ref,
                           b2_ref, ga_ref, *rest,
                           hw, cg, eps, slope, has_downsample):
    if has_downsample:
        wd_ref, o_ref = rest
    else:
        (o_ref,) = rest

    xb = x_ref[...]                          # (B, HW, Cin) bf16 straight from HBM
    ga = ga_ref[...]                         # (Cout, G) channel->group one-hot, f32

    conv_dn = (((2,), (0,)), ((), ()))       # contract channel dim against weight rows
    scat_dn = (((1,), (1,)), ((), ()))       # contract group dim against one-hot cols

    def conv(a_bf16, w_ref):
        # (B, HW, Cin) @ (Cin, Cout) -> (B, HW, Cout); bf16 operands, f32 MXU accumulate
        return jax.lax.dot_general(a_bf16, w_ref[...], dimension_numbers=conv_dn,
                                   preferred_element_type=jnp.float32)

    def group_norm(h, gamma_ref, beta_ref):
        # h: (B, HW, Cout) f32.  Per-sample GroupNorm over (HW, channels-in-group).
        gamma = gamma_ref[...]               # (1, Cout)
        beta = beta_ref[...]                 # (1, Cout)
        inv_n = 1.0 / float(hw * cg)
        s1 = jnp.sum(h, axis=1)              # (B, Cout)
        s2 = jnp.sum(h * h, axis=1)          # (B, Cout)
        # per-group reduce / scatter via tiny one-hot matmuls (no cross-lane reshape).
        # NOTE: single-pass E[x^2]-E[x]^2 variance in f32 with a clamp; adequate for
        # post-conv activation magnitudes (PyTorch uses a two-pass formula).
        sg1 = jnp.dot(s1, ga, preferred_element_type=jnp.float32)   # (B, G)
        sg2 = jnp.dot(s2, ga, preferred_element_type=jnp.float32)   # (B, G)
        mu = sg1 * inv_n
        var = jnp.maximum(sg2 * inv_n - mu * mu, 0.0)
        inv = jax.lax.rsqrt(var + eps)
        mu_c = jax.lax.dot_general(mu, ga, dimension_numbers=scat_dn,
                                   preferred_element_type=jnp.float32)   # (B, Cout)
        inv_c = jax.lax.dot_general(inv, ga, dimension_numbers=scat_dn,
                                    preferred_element_type=jnp.float32)  # (B, Cout)
        # fold affine: one fused scale/bias pass over the big slab
        scale = inv_c * gamma
        bias = beta - mu_c * scale
        return h * scale[:, None, :] + bias[:, None, :]

    def lrelu(v):
        return jnp.where(v > 0, v, slope * v)

    h = conv(xb, w1_ref)                     # conv1
    if has_downsample:
        identity = conv(xb, wd_ref)          # same LHS as conv1 -> issued back-to-back
    else:
        identity = xb.astype(jnp.float32)    # inplanes == planes: skip the matmul
    h = lrelu(group_norm(h, g1_ref, b1_ref))
    h = conv(h.astype(jnp.bfloat16), w2_ref)  # conv2
    h = group_norm(h, g2_ref, b2_ref)
    o_ref[...] = lrelu(h + identity).astype(o_ref.dtype)


# ----------------------------------------------------------------------------
# Wrappers
# ----------------------------------------------------------------------------
def basic_block_gn_nhwc(x_flat, params, *, negative_slope=0.2, eps=1e-5):
    """Core entry point.  x_flat: (N, S, Cin); cast to bf16 for HBM/MXU traffic.
    params: w1 (Cin,Cout), w2 (Cout,Cout), optional wd (Cin,Cout) (required iff
    Cin != Cout), gamma1/beta1/gamma2/beta2 broadcastable to (1, Cout).
    Returns (N, S, Cout) bf16."""
    N, S, Cin = x_flat.shape
    Cout = params["w1"].shape[1]
    wd = params.get("wd", None)
    has_downsample = wd is not None
    if not has_downsample and Cin != Cout:
        raise ValueError("downsample weight 'wd' required when inplanes != planes")

    groups = get_groups_count(Cout)
    cg = Cout // groups
    f32 = jnp.float32

    x_bf = x_flat.astype(jnp.bfloat16)
    w1 = jnp.asarray(params["w1"], f32).astype(jnp.bfloat16)
    w2 = jnp.asarray(params["w2"], f32).astype(jnp.bfloat16)
    g1 = jnp.asarray(params["gamma1"], f32).reshape(1, Cout)
    b1 = jnp.asarray(params["beta1"], f32).reshape(1, Cout)
    g2 = jnp.asarray(params["gamma2"], f32).reshape(1, Cout)
    b2 = jnp.asarray(params["beta2"], f32).reshape(1, Cout)
    wd_bf = jnp.asarray(wd, f32).astype(jnp.bfloat16) if has_downsample else None

    # channel -> group one-hot (GN stat gather/scatter as tiny matmuls)
    ga = (jnp.arange(Cout)[:, None] // cg == jnp.arange(groups)[None, :]).astype(f32)

    # ---- VMEM budgeting / tile selection ------------------------------------
    vmem_cap = _vmem_capacity_bytes()
    vmem_limit = (vmem_cap * 3) // 4                       # explicit scoped limit
    const_bytes = 2 * (int(w1.size) + int(w2.size)
                       + (int(wd_bf.size) if has_downsample else 0)) \
        + 4 * (int(g1.size) + int(b1.size) + int(g2.size) + int(b2.size) + int(ga.size))
    row_budget = max((vmem_limit * 4) // 5 - 2 * const_bytes, 1)
    cores = _num_tensorcores()
    min_steps = 1 if cores <= 1 else 2 * cores             # >=2 steps/core on multi-TC
    B = _pick_batch_tile(N, S, Cin, Cout, row_budget, min_steps)
    grid = (N // B,)

    # ---- cost estimate (padded-free shapes, actual dtypes) ------------------
    flops = 2 * N * S * Cin * Cout + 2 * N * S * Cout * Cout
    if has_downsample:
        flops += 2 * N * S * Cin * Cout
    flops += 8 * N * Cout * groups                         # GN gather/scatter matmuls
    bytes_accessed = 2 * (int(x_bf.size) + N * S * Cout) + const_bytes
    cost = pl.CostEstimate(flops=int(flops), transcendentals=int(2 * N * groups),
                           bytes_accessed=int(bytes_accessed))

    kernel = functools.partial(
        _basic_block_gn_kernel,
        hw=S, cg=cg, eps=eps, slope=negative_slope, has_downsample=has_downsample)

    in_specs = [
        pl.BlockSpec((B, S, Cin), lambda n: (n, 0, 0)),    # x (bf16)
        _const_spec((Cin, Cout)),                          # w1
        _const_spec((1, Cout)),                            # gamma1
        _const_spec((1, Cout)),                            # beta1
        _const_spec((Cout, Cout)),                         # w2
        _const_spec((1, Cout)),                            # gamma2
        _const_spec((1, Cout)),                            # beta2
        _const_spec((Cout, groups)),                       # group one-hot
    ]
    args = [x_bf, w1, g1, b1, w2, g2, b2, ga]
    if has_downsample:
        in_specs.append(_const_spec((Cin, Cout)))          # downsample weight
        args.append(wd_bf)

    return pl.pallas_call(
        kernel,
        out_shape=jax.ShapeDtypeStruct((N, S, Cout), jnp.bfloat16),
        grid=grid,
        in_specs=in_specs,
        out_specs=pl.BlockSpec((B, S, Cout), lambda n: (n, 0, 0)),
        compiler_params=pltpu.CompilerParams(
            dimension_semantics=("parallel",),
            vmem_limit_bytes=int(vmem_limit)),
        cost_estimate=cost,
    )(*args)


def basic_block_gn_forward(x_nchw, params, *, negative_slope=0.2, eps=1e-5):
    """PyTorch-interface wrapper: NCHW in -> NCHW out (bf16).
    conv weights stored as (Cin, Cout) == Conv2d.weight[:, :, 0, 0].T"""
    N, Cin, H, W = x_nchw.shape
    Cout = params["w1"].shape[1]
    # TODO(synk): keep activations NHWC across the network to drop these two transposes.
    x_flat = jnp.transpose(x_nchw, (0, 2, 3, 1)).reshape(N, H * W, Cin)
    out = basic_block_gn_nhwc(x_flat, params, negative_slope=negative_slope, eps=eps)
    return jnp.transpose(out.reshape(N, H, W, Cout), (0, 3, 1, 2))


# ----------------------------------------------------------------------------
# Pure-JAX reference (PyTorch semantics; precision-matched to the kernel)
# ----------------------------------------------------------------------------
def _ref_group_norm(h, gamma, beta, groups, eps):
    n, s, c = h.shape
    hg = h.reshape(n, s, groups, c // groups)
    mu = hg.mean(axis=(1, 3), keepdims=True)
    var = ((hg - mu) ** 2).mean(axis=(1, 3), keepdims=True)
    hn = ((hg - mu) * jax.lax.rsqrt(var + eps)).reshape(n, s, c)
    return hn * jnp.asarray(gamma, jnp.float32) + jnp.asarray(beta, jnp.float32)


def ref_forward_nchw(x, params, negative_slope=0.2, eps=1e-5, matmul_dtype=jnp.bfloat16):
    n, cin, hh, ww = x.shape
    cout = params["w1"].shape[1]
    groups = get_groups_count(cout)
    a = jnp.transpose(x, (0, 2, 3, 1)).reshape(n, hh * ww, cin).astype(matmul_dtype)

    def conv(t, w):
        return jnp.einsum("nsc,co->nso", t.astype(matmul_dtype),
                          jnp.asarray(w, jnp.float32).astype(matmul_dtype),
                          preferred_element_type=jnp.float32)

    lrelu = lambda v: jnp.where(v > 0, v, negative_slope * v)
    h = conv(a, params["w1"])
    h = lrelu(_ref_group_norm(h, params["gamma1"], params["beta1"], groups, eps))
    h = conv(h, params["w2"])
    h = _ref_group_norm(h, params["gamma2"], params["beta2"], groups, eps)
    identity = conv(a, params["wd"]) if params.get("wd") is not None else a.astype(jnp.float32)
    out = lrelu(h + identity)
    return jnp.transpose(out.reshape(n, hh, ww, cout), (0, 3, 1, 2))


# ----------------------------------------------------------------------------
# Main
# ----------------------------------------------------------------------------
if __name__ == "__main__":
    key = jax.random.PRNGKey(0)
    keys = jax.random.split(key, 10)

    def make_params(cin, cout, with_downsample, ks):
        p = {
            "w1": jax.random.normal(ks[0], (cin, cout), jnp.float32) * 0.1,
            "w2": jax.random.normal(ks[1], (cout, cout), jnp.float32) * 0.1,
            "gamma1": 1.0 + 0.05 * jax.random.normal(ks[2], (1, cout), jnp.float32),
            "beta1": 0.05 * jax.random.normal(ks[3], (1, cout), jnp.float32),
            "gamma2": 1.0 + 0.05 * jax.random.normal(ks[4], (1, cout), jnp.float32),
            "beta2": 0.05 * jax.random.normal(ks[5], (1, cout), jnp.float32),
        }
        if with_downsample:
            p["wd"] = jax.random.normal(ks[6], (cin, cout), jnp.float32) * 0.1
        return p

    # 1) inplanes != planes -> 1x1-conv downsample path
    N, Cin, Cout, H, W = 4, 16, 32, 8, 8
    x = jax.random.normal(keys[0], (N, Cin, H, W), jnp.float32)
    params = make_params(Cin, Cout, True, keys[1:8])
    out = jax.block_until_ready(basic_block_gn_forward(x, params))
    assert out.shape == (N, Cout, H, W)
    ref = ref_forward_nchw(x, params)
    assert jnp.allclose(out.astype(jnp.float32), ref, atol=5e-2, rtol=5e-2), \
        "downsample path mismatch vs matched-precision reference"

    # 2) inplanes == planes -> identity skip (no downsample matmul in the kernel)
    x2 = jax.random.normal(keys[8], (N, Cout, H, W), jnp.float32)
    params2 = make_params(Cout, Cout, False, jax.random.split(keys[9], 7))
    out2 = jax.block_until_ready(basic_block_gn_forward(x2, params2))
    assert out2.shape == (N, Cout, H, W)
    ref2 = ref_forward_nchw(x2, params2)
    assert jnp.allclose(out2.astype(jnp.float32), ref2, atol=5e-2, rtol=5e-2), \
        "identity path mismatch vs matched-precision reference"

    print("KERNEL_OK")
</pallas_src>

<mosaic_0001>
module attributes {stable_mosaic.version = 11 : i64} {
  func.func @_basic_block_gn_kernel(%arg0: i32, %arg1: memref<4x64x16xbf16, #tpu.memory_space<vmem>>, %arg2: memref<16x32xbf16, #tpu.memory_space<vmem>>, %arg3: memref<1x32xf32, #tpu.memory_space<vmem>>, %arg4: memref<1x32xf32, #tpu.memory_space<vmem>>, %arg5: memref<32x32xbf16, #tpu.memory_space<vmem>>, %arg6: memref<1x32xf32, #tpu.memory_space<vmem>>, %arg7: memref<1x32xf32, #tpu.memory_space<vmem>>, %arg8: memref<32x8xf32, #tpu.memory_space<vmem>>, %arg9: memref<16x32xbf16, #tpu.memory_space<vmem>>, %arg10: memref<4x64x32xbf16, #tpu.memory_space<vmem>>) attributes {dimension_semantics = [#tpu.dimension_semantics<parallel>], iteration_bounds = array<i64: 1>, scalar_prefetch = 0 : i64, scratch_operands = 0 : i64, tpu.core_type = #tpu.core_type<tc>, window_params = [{transform_indices = @transform_0, window_bounds = array<i64: 4, 64, 16>}, {pipeline_mode = #tpu.pipeline_mode<synchronous>, transform_indices = @transform_1, window_bounds = array<i64: 16, 32>}, {pipeline_mode = #tpu.pipeline_mode<synchronous>, transform_indices = @transform_2, window_bounds = array<i64: 1, 32>}, {pipeline_mode = #tpu.pipeline_mode<synchronous>, transform_indices = @transform_3, window_bounds = array<i64: 1, 32>}, {pipeline_mode = #tpu.pipeline_mode<synchronous>, transform_indices = @transform_4, window_bounds = array<i64: 32, 32>}, {pipeline_mode = #tpu.pipeline_mode<synchronous>, transform_indices = @transform_5, window_bounds = array<i64: 1, 32>}, {pipeline_mode = #tpu.pipeline_mode<synchronous>, transform_indices = @transform_6, window_bounds = array<i64: 1, 32>}, {pipeline_mode = #tpu.pipeline_mode<synchronous>, transform_indices = @transform_7, window_bounds = array<i64: 32, 8>}, {pipeline_mode = #tpu.pipeline_mode<synchronous>, transform_indices = @transform_8, window_bounds = array<i64: 16, 32>}, {transform_indices = @transform_9, window_bounds = array<i64: 4, 64, 32>}]} {
    %c0 = arith.constant 0 : index
    %c0_0 = arith.constant 0 : index
    %c0_1 = arith.constant 0 : index
    %0 = vector.load %arg1[%c0, %c0_0, %c0_1] : memref<4x64x16xbf16, #tpu.memory_space<vmem>>, vector<4x64x16xbf16>
    %c0_2 = arith.constant 0 : index
    %c0_3 = arith.constant 0 : index
    %1 = vector.load %arg8[%c0_2, %c0_3] : memref<32x8xf32, #tpu.memory_space<vmem>>, vector<32x8xf32>
    %c0_4 = arith.constant 0 : index
    %c0_5 = arith.constant 0 : index
    %2 = vector.load %arg2[%c0_4, %c0_5] : memref<16x32xbf16, #tpu.memory_space<vmem>>, vector<16x32xbf16>
    %cst = arith.constant dense<0.000000e+00> : vector<4x64x32xf32>
    %3 = tpu.matmul %0, %2, %cst {dimension_numbers = #tpu.dot_dimension_numbers<[2], [0], [0, 1], [1], [0, 0, 0, 1, 1, 1], [], []>} : vector<4x64x16xbf16>, vector<16x32xbf16>, vector<4x64x32xf32> -> vector<4x64x32xf32>
    %c0_6 = arith.constant 0 : index
    %c0_7 = arith.constant 0 : index
    %4 = vector.load %arg9[%c0_6, %c0_7] : memref<16x32xbf16, #tpu.memory_space<vmem>>, vector<16x32xbf16>
    %cst_8 = arith.constant dense<0.000000e+00> : vector<4x64x32xf32>
    %5 = tpu.matmul %0, %4, %cst_8 {dimension_numbers = #tpu.dot_dimension_numbers<[2], [0], [0, 1], [1], [0, 0, 0, 1, 1, 1], [], []>} : vector<4x64x16xbf16>, vector<16x32xbf16>, vector<4x64x32xf32> -> vector<4x64x32xf32>
    %c0_9 = arith.constant 0 : index
    %c0_10 = arith.constant 0 : index
    %6 = vector.load %arg3[%c0_9, %c0_10] : memref<1x32xf32, #tpu.memory_space<vmem>>, vector<1x32xf32>
    %c0_11 = arith.constant 0 : index
    %c0_12 = arith.constant 0 : index
    %7 = vector.load %arg4[%c0_11, %c0_12] : memref<1x32xf32, #tpu.memory_space<vmem>>, vector<1x32xf32>
    %cst_13 = arith.constant dense<0.000000e+00> : vector<4x32xf32>
    %8 = vector.multi_reduction <add>, %3, %cst_13 [1] : vector<4x64x32xf32> to vector<4x32xf32>
    %9 = arith.mulf %3, %3 : vector<4x64x32xf32>
    %cst_14 = arith.constant dense<0.000000e+00> : vector<4x32xf32>
    %10 = vector.multi_reduction <add>, %9, %cst_14 [1] : vector<4x64x32xf32> to vector<4x32xf32>
    %cst_15 = arith.constant dense<0.000000e+00> : vector<4x8xf32>
    %11 = tpu.matmul %8, %1, %cst_15 {dimension_numbers = #tpu.dot_dimension_numbers<[1], [0], [0], [1], [0, 0, 1, 1], [], []>} : vector<4x32xf32>, vector<32x8xf32>, vector<4x8xf32> -> vector<4x8xf32>
    %cst_16 = arith.constant dense<0.000000e+00> : vector<4x8xf32>
    %12 = tpu.matmul %10, %1, %cst_16 {dimension_numbers = #tpu.dot_dimension_numbers<[1], [0], [0], [1], [0, 0, 1, 1], [], []>} : vector<4x32xf32>, vector<32x8xf32>, vector<4x8xf32> -> vector<4x8xf32>
    %cst_17 = arith.constant 3.906250e-03 : f32
    %13 = vector.broadcast %cst_17 : f32 to vector<4x8xf32>
    %14 = arith.mulf %11, %13 : vector<4x8xf32>
    %cst_18 = arith.constant 3.906250e-03 : f32
    %15 = vector.broadcast %cst_18 : f32 to vector<4x8xf32>
    %16 = arith.mulf %12, %15 : vector<4x8xf32>
    %17 = arith.mulf %14, %14 : vector<4x8xf32>
    %18 = arith.subf %16, %17 : vector<4x8xf32>
    %cst_19 = arith.constant 0.000000e+00 : f32
    %19 = vector.broadcast %cst_19 : f32 to vector<4x8xf32>
    %20 = arith.maximumf %18, %19 : vector<4x8xf32>
    %cst_20 = arith.constant 9.99999974E-6 : f32
    %21 = vector.broadcast %cst_20 : f32 to vector<4x8xf32>
    %22 = arith.addf %20, %21 : vector<4x8xf32>
    %23 = math.rsqrt %22 : vector<4x8xf32>
    %cst_21 = arith.constant dense<0.000000e+00> : vector<4x32xf32>
    %24 = tpu.matmul %14, %1, %cst_21 {dimension_numbers = #tpu.dot_dimension_numbers<[1], [1], [0], [0], [0, 0, 1, 0], [], []>} : vector<4x8xf32>, vector<32x8xf32>, vector<4x32xf32> -> vector<4x32xf32>
    %cst_22 = arith.constant dense<0.000000e+00> : vector<4x32xf32>
    %25 = tpu.matmul %23, %1, %cst_22 {dimension_numbers = #tpu.dot_dimension_numbers<[1], [1], [0], [0], [0, 0, 1, 0], [], []>} : vector<4x8xf32>, vector<32x8xf32>, vector<4x32xf32> -> vector<4x32xf32>
    %26 = vector.broadcast %6 : vector<1x32xf32> to vector<4x32xf32>
    %27 = arith.mulf %25, %26 : vector<4x32xf32>
    %28 = arith.mulf %24, %27 : vector<4x32xf32>
    %29 = vector.broadcast %7 : vector<1x32xf32> to vector<4x32xf32>
    %30 = arith.subf %29, %28 : vector<4x32xf32>
    %31 = vector.shape_cast %27 : vector<4x32xf32> to vector<4x1x32xf32>
    %32 = vector.broadcast %31 : vector<4x1x32xf32> to vector<4x64x32xf32>
    %33 = arith.mulf %3, %32 : vector<4x64x32xf32>
    %34 = vector.shape_cast %30 : vector<4x32xf32> to vector<4x1x32xf32>
    %35 = vector.broadcast %34 : vector<4x1x32xf32> to vector<4x64x32xf32>
    %36 = arith.addf %33, %35 : vector<4x64x32xf32>
    %cst_23 = arith.constant 0.000000e+00 : f32
    %37 = vector.broadcast %cst_23 : f32 to vector<4x64x32xf32>
    %38 = arith.cmpf ogt, %36, %37 : vector<4x64x32xf32>
    %cst_24 = arith.constant 2.000000e-01 : f32
    %39 = vector.broadcast %cst_24 : f32 to vector<4x64x32xf32>
    %40 = arith.mulf %39, %36 : vector<4x64x32xf32>
    %41 = arith.select %38, %36, %40 : vector<4x64x32xi1>, vector<4x64x32xf32>
    %42 = arith.truncf %41 : vector<4x64x32xf32> to vector<4x64x32xbf16>
    %c0_25 = arith.constant 0 : index
    %c0_26 = arith.constant 0 : index
    %43 = vector.load %arg5[%c0_25, %c0_26] : memref<32x32xbf16, #tpu.memory_space<vmem>>, vector<32x32xbf16>
    %cst_27 = arith.constant dense<0.000000e+00> : vector<4x64x32xf32>
    %44 = tpu.matmul %42, %43, %cst_27 {dimension_numbers = #tpu.dot_dimension_numbers<[2], [0], [0, 1], [1], [0, 0, 0, 1, 1, 1], [], []>} : vector<4x64x32xbf16>, vector<32x32xbf16>, vector<4x64x32xf32> -> vector<4x64x32xf32>
    %c0_28 = arith.constant 0 : index
    %c0_29 = arith.constant 0 : index
    %45 = vector.load %arg6[%c0_28, %c0_29] : memref<1x32xf32, #tpu.memory_space<vmem>>, vector<1x32xf32>
    %c0_30 = arith.constant 0 : index
    %c0_31 = arith.constant 0 : index
    %46 = vector.load %arg7[%c0_30, %c0_31] : memref<1x32xf32, #tpu.memory_space<vmem>>, vector<1x32xf32>
    %cst_32 = arith.constant dense<0.000000e+00> : vector<4x32xf32>
    %47 = vector.multi_reduction <add>, %44, %cst_32 [1] : vector<4x64x32xf32> to vector<4x32xf32>
    %48 = arith.mulf %44, %44 : vector<4x64x32xf32>
    %cst_33 = arith.constant dense<0.000000e+00> : vector<4x32xf32>
    %49 = vector.multi_reduction <add>, %48, %cst_33 [1] : vector<4x64x32xf32> to vector<4x32xf32>
    %cst_34 = arith.constant dense<0.000000e+00> : vector<4x8xf32>
    %50 = tpu.matmul %47, %1, %cst_34 {dimension_numbers = #tpu.dot_dimension_numbers<[1], [0], [0], [1], [0, 0, 1, 1], [], []>} : vector<4x32xf32>, vector<32x8xf32>, vector<4x8xf32> -> vector<4x8xf32>
    %cst_35 = arith.constant dense<0.000000e+00> : vector<4x8xf32>
    %51 = tpu.matmul %49, %1, %cst_35 {dimension_numbers = #tpu.dot_dimension_numbers<[1], [0], [0], [1], [0, 0, 1, 1], [], []>} : vector<4x32xf32>, vector<32x8xf32>, vector<4x8xf32> -> vector<4x8xf32>
    %cst_36 = arith.constant 3.906250e-03 : f32
    %52 = vector.broadcast %cst_36 : f32 to vector<4x8xf32>
    %53 = arith.mulf %50, %52 : vector<4x8xf32>
    %cst_37 = arith.constant 3.906250e-03 : f32
    %54 = vector.broadcast %cst_37 : f32 to vector<4x8xf32>
    %55 = arith.mulf %51, %54 : vector<4x8xf32>
    %56 = arith.mulf %53, %53 : vector<4x8xf32>
    %57 = arith.subf %55, %56 : vector<4x8xf32>
    %cst_38 = arith.constant 0.000000e+00 : f32
    %58 = vector.broadcast %cst_38 : f32 to vector<4x8xf32>
    %59 = arith.maximumf %57, %58 : vector<4x8xf32>
    %cst_39 = arith.constant 9.99999974E-6 : f32
    %60 = vector.broadcast %cst_39 : f32 to vector<4x8xf32>
    %61 = arith.addf %59, %60 : vector<4x8xf32>
    %62 = math.rsqrt %61 : vector<4x8xf32>
    %cst_40 = arith.constant dense<0.000000e+00> : vector<4x32xf32>
    %63 = tpu.matmul %53, %1, %cst_40 {dimension_numbers = #tpu.dot_dimension_numbers<[1], [1], [0], [0], [0, 0, 1, 0], [], []>} : vector<4x8xf32>, vector<32x8xf32>, vector<4x32xf32> -> vector<4x32xf32>
    %cst_41 = arith.constant dense<0.000000e+00> : vector<4x32xf32>
    %64 = tpu.matmul %62, %1, %cst_41 {dimension_numbers = #tpu.dot_dimension_numbers<[1], [1], [0], [0], [0, 0, 1, 0], [], []>} : vector<4x8xf32>, vector<32x8xf32>, vector<4x32xf32> -> vector<4x32xf32>
    %65 = vector.broadcast %45 : vector<1x32xf32> to vector<4x32xf32>
    %66 = arith.mulf %64, %65 : vector<4x32xf32>
    %67 = arith.mulf %63, %66 : vector<4x32xf32>
    %68 = vector.broadcast %46 : vector<1x32xf32> to vector<4x32xf32>
    %69 = arith.subf %68, %67 : vector<4x32xf32>
    %70 = vector.shape_cast %66 : vector<4x32xf32> to vector<4x1x32xf32>
    %71 = vector.broadcast %70 : vector<4x1x32xf32> to vector<4x64x32xf32>
    %72 = arith.mulf %44, %71 : vector<4x64x32xf32>
    %73 = vector.shape_cast %69 : vector<4x32xf32> to vector<4x1x32xf32>
    %74 = vector.broadcast %73 : vector<4x1x32xf32> to vector<4x64x32xf32>
    %75 = arith.addf %72, %74 : vector<4x64x32xf32>
    %76 = arith.addf %75, %5 : vector<4x64x32xf32>
    %cst_42 = arith.constant 0.000000e+00 : f32
    %77 = vector.broadcast %cst_42 : f32 to vector<4x64x32xf32>
    %78 = arith.cmpf ogt, %76, %77 : vector<4x64x32xf32>
    %cst_43 = arith.constant 2.000000e-01 : f32
    %79 = vector.broadcast %cst_43 : f32 to vector<4x64x32xf32>
    %80 = arith.mulf %79, %76 : vector<4x64x32xf32>
    %81 = arith.select %78, %76, %80 : vector<4x64x32xi1>, vector<4x64x32xf32>
    %82 = arith.truncf %81 : vector<4x64x32xf32> to vector<4x64x32xbf16>
    %c0_44 = arith.constant 0 : index
    %c0_45 = arith.constant 0 : index
    %c0_46 = arith.constant 0 : index
    %83 = vector.load %arg10[%c0_44, %c0_45, %c0_46] : memref<4x64x32xbf16, #tpu.memory_space<vmem>>, vector<4x64x32xbf16>
    tpu.vector_store %arg10[%c0_44, %c0_45, %c0_46], %82 {strides = array<i32>} : memref<4x64x32xbf16, #tpu.memory_space<vmem>>, vector<4x64x32xbf16>,
    return
  }
  func.func @transform_0(%arg0: i32) -> (i32, i32, i32) {
    %c0_i32 = arith.constant 0 : i32
    %c0_i32_0 = arith.constant 0 : i32
    %c0_i32_1 = arith.constant 0 : i32
    return %arg0, %c0_i32, %c0_i32_0 : i32, i32, i32
  }
  func.func @transform_1(%arg0: i32) -> (i32, i32) {
    %c0_i32 = arith.constant 0 : i32
    %c0_i32_0 = arith.constant 0 : i32
    %c0_i32_1 = arith.constant 0 : i32
    return %c0_i32, %c0_i32_0 : i32, i32
  }
  func.func @transform_2(%arg0: i32) -> (i32, i32) {
    %c0_i32 = arith.constant 0 : i32
    %c0_i32_0 = arith.constant 0 : i32
    %c0_i32_1 = arith.constant 0 : i32
    return %c0_i32, %c0_i32_0 : i32, i32
  }
  func.func @transform_3(%arg0: i32) -> (i32, i32) {
    %c0_i32 = arith.constant 0 : i32
    %c0_i32_0 = arith.constant 0 : i32
    %c0_i32_1 = arith.constant 0 : i32
    return %c0_i32, %c0_i32_0 : i32, i32
  }
  func.func @transform_4(%arg0: i32) -> (i32, i32) {
    %c0_i32 = arith.constant 0 : i32
    %c0_i32_0 = arith.constant 0 : i32
    %c0_i32_1 = arith.constant 0 : i32
    return %c0_i32, %c0_i32_0 : i32, i32
  }
  func.func @transform_5(%arg0: i32) -> (i32, i32) {
    %c0_i32 = arith.constant 0 : i32
    %c0_i32_0 = arith.constant 0 : i32
    %c0_i32_1 = arith.constant 0 : i32
    return %c0_i32, %c0_i32_0 : i32, i32
  }
  func.func @transform_6(%arg0: i32) -> (i32, i32) {
    %c0_i32 = arith.constant 0 : i32
    %c0_i32_0 = arith.constant 0 : i32
    %c0_i32_1 = arith.constant 0 : i32
    return %c0_i32, %c0_i32_0 : i32, i32
  }
  func.func @transform_7(%arg0: i32) -> (i32, i32) {
    %c0_i32 = arith.constant 0 : i32
    %c0_i32_0 = arith.constant 0 : i32
    %c0_i32_1 = arith.constant 0 : i32
    return %c0_i32, %c0_i32_0 : i32, i32
  }
  func.func @transform_8(%arg0: i32) -> (i32, i32) {
    %c0_i32 = arith.constant 0 : i32
    %c0_i32_0 = arith.constant 0 : i32
    %c0_i32_1 = arith.constant 0 : i32
    return %c0_i32, %c0_i32_0 : i32, i32
  }
  func.func @transform_9(%arg0: i32) -> (i32, i32, i32) {
    %c0_i32 = arith.constant 0 : i32
    %c0_i32_0 = arith.constant 0 : i32
    %c0_i32_1 = arith.constant 0 : i32
    return %arg0, %c0_i32, %c0_i32_0 : i32, i32, i32
  }
}

</mosaic_0001>

<bundles_post_ra>
// kernel: tpu_custom_call.1
= control target key start
LH: loop header
LB: loop body
LE: loop exit
PB: predicated region body
PF: predicated region fallthrough
CT: control target
= control target key end

     0   :  { %vm157_vm0 = vcmask 130048   ;;  %vm394_vm1 = vcmask 261120   ;;  %vm599_vm2 = vcmask 1041409   ;;  %vm601_vm3 = vcmask 1042434   ;;  %s3374_s1 = inlined_call_operand.vmem [shape: bf16[16,32], index: 1, kind: input, shape index: {}]   ;;  %s3375_s0 = inlined_call_operand.vmem [shape: bf16[4,64,16], index: 0, kind: input, shape index: {}]   ;;  %s3376_s8 = inlined_call_operand.vmem [shape: bf16[16,32], index: 8, kind: input, shape index: {}]   ;;  %s3377_s7 = inlined_call_operand.vmem [shape: f32[32,8], index: 7, kind: input, shape index: {}]   ;;  %s3378_s2 = inlined_call_operand.vmem [shape: f32[1,32], index: 2, kind: input, shape index: {}]   ;;  %s3379_s3 = inlined_call_operand.vmem [shape: f32[1,32], index: 3, kind: input, shape index: {}]   ;;  %s3380_s4 = inlined_call_operand.vmem [shape: bf16[32,32], index: 4, kind: input, shape index: {}]   ;;  %s3381_s5 = inlined_call_operand.vmem [shape: f32[1,32], index: 5, kind: input, shape index: {}]   ;;  %s3382_s6 = inlined_call_operand.vmem [shape: f32[1,32], index: 6, kind: input, shape index: {}]   ;;  %s3383_s9 = inlined_call_operand.vmem [shape: bf16[4,64,32], index: 9, kind: output, shape index: {}]  }
   0x1   :  { %v1973_v0 = vld [vmem:[%s3374_s1] sm:$0xff]  ;;  %v1958_v2 = vld [vmem:[%s3375_s0 + $0x8] sm:$0xff]  ;;  %v2059_v3 = vld [vmem:[%s3375_s0 + $0x10] sm:$0xff]  ;;  %vm603_vm4 = vcmask 1043459   ;;  %vm672_vm5 = vcmask 64512  }
   0x2   :  { %v1957_v1 = vld [vmem:[%s3375_s0] sm:$0xff]  ;;  %213 = vmatpush.bf16.msra.mxu0 %v1973_v0  ;;  %1977 = vmatpush.bf16.msra.mxu3 %v1973_v0  ;;  %v2066_v4 = vld [vmem:[%s3375_s0 + $0x18] sm:$0xff]  ;;  %v2080_v6 = vld [vmem:[%s3375_s0 + $0x28] sm:$0xff] }
   0x3   :  { %v2073_v5 = vld [vmem:[%s3375_s0 + $0x20] sm:$0xff]  ;;  %v2087_v7 = vld [vmem:[%s3375_s0 + $0x30] sm:$0xff]  ;;  %v2094_v8 = vld [vmem:[%s3375_s0 + $0x38] sm:$0xff] }
   0x4   :  { %v2101_v9 = vld [vmem:[%s3375_s0 + $0x40] sm:$0xff]  ;;  %v2112_v12 = vld [vmem:[%s3375_s0 + $0x48] sm:$0xff]  ;;  %v1971_v15 = vld [vmem:[%s3375_s0 + $0x70] sm:$0xff] }
   0x5   :  { %1873 = vmatmul.msk.bf16.vlgmr.msra.gmra.mxu0 %vm157_vm0, %v1957_v1  ;;  %1887 = vmatmul.msk.bf16.vlgmr.msra.gmra.mxu3 %vm157_vm0, %v1971_v15  ;;  %v2127_v16 = vld [vmem:[%s3375_s0 + $0x50] sm:$0xff]  ;;  %v1972_v19 = vld [vmem:[%s3375_s0 + $0x78] sm:$0xff]  ;;  %v1969_v23 = vld [vmem:[%s3375_s0 + $0x60] sm:$0xff] }
   0x6   :  { %v2142_v20 = vld [vmem:[%s3375_s0 + $0x58] sm:$0xff]  ;;  %v1970_v26 = vld [vmem:[%s3375_s0 + $0x68] sm:$0xff]  ;;  %v1974_v36 = vld [vmem:[%s3376_s8] sm:$0xff] }
   0x7   :  { %1978 = vmatpush.bf16.msrb.mxu3 %v1974_v36  ;;  %310 = vmatpush.bf16.msra.mxu1 %v1974_v36  ;;  %v2206_v45 = vld [vmem:[%s3377_s7 + $0x18] sm:$0xff] }
   0x8   :  { %619 = vmatpush.msra.mxu2 %v2206_v45 }
   0xa   :  { %1893 = vmatmul.msk.bf16.vlgmr.msra.gmra.mxu1 %vm157_vm0, %v1957_v1 }
   0xb   :  { %648 = vmatpush.msra.mxu3 %v2206_v45 }
  0x15   :  { %1874 = vmatmul.msk.bf16.gmra.mxu0 %vm157_vm0, %v1958_v2  ;;  %1888 = vmatmul.msk.bf16.gmra.mxu3 %vm157_vm0, %v1972_v19 }
  0x1a   :  { %1894 = vmatmul.msk.bf16.gmra.mxu1 %vm157_vm0, %v1958_v2 }
  0x25   :  { %1875 = vmatmul.msk.bf16.gmra.mxu0 %vm157_vm0, %v2059_v3  ;;  %1907 = vmatmul.msk.bf16.vlgmr.msrb.gmra.mxu3 %vm157_vm0, %v1971_v15 }
  0x2a   :  { %1895 = vmatmul.msk.bf16.gmra.mxu1 %vm157_vm0, %v2059_v3 }
  0x35   :  { %1876 = vmatmul.msk.bf16.gmra.mxu0 %vm157_vm0, %v2066_v4  ;;  %1908 = vmatmul.msk.bf16.gmra.mxu3 %vm157_vm0, %v1972_v19 }
  0x3a   :  { %1896 = vmatmul.msk.bf16.gmra.mxu1 %vm157_vm0, %v2066_v4  ;;  %v2326_v4 = vld [vmem:[%s3377_s7 + $0x10] sm:$0xff] }
  0x3b   :  { %649 = vmatpush.msra.mxu3 %v2326_v4  ;;  %620 = vmatpush.msra.mxu2 %v2326_v4 }
  0x45   :  { %1877 = vmatmul.msk.bf16.gmra.mxu0 %vm157_vm0, %v2073_v5 }
  0x4a   :  { %1897 = vmatmul.msk.bf16.gmra.mxu1 %vm157_vm0, %v2073_v5 }
  0x55   :  { %1878 = vmatmul.msk.bf16.gmra.mxu0 %vm157_vm0, %v2080_v6 }
  0x5a   :  { %1898 = vmatmul.msk.bf16.gmra.mxu1 %vm157_vm0, %v2080_v6 }
  0x65   :  { %1879 = vmatmul.msk.bf16.gmra.mxu0 %vm157_vm0, %v2087_v7 }
  0x6a   :  { %1899 = vmatmul.msk.bf16.gmra.mxu1 %vm157_vm0, %v2087_v7 }
  0x75   :  { %1880 = vmatmul.msk.bf16.gmra.mxu0 %vm157_vm0, %v2094_v8 }
  0x7a   :  { %1900 = vmatmul.msk.bf16.gmra.mxu1 %vm157_vm0, %v2094_v8 }
  0x82   :  { %v2103_v10 = vpop.f32.mrf.mxu0 }
  0x83   :  { %v479_v42 = vmul.f32 %v2103_v10, %v2103_v10  ;;  %v395_v48 = vsel %vm394_vm1, %v2103_v10, 0.0 }
  0x85   :  { %1881 = vmatmul.msk.bf16.gmra.mxu0 %vm157_vm0, %v2101_v9  ;;  %v511_v50 = vsel %vm394_vm1, %v479_v42, 0.0 }
  0x8a   :  { %v2107_v11 = vpop.f32.mrf.mxu0  ;;  %1901 = vmatmul.msk.bf16.gmra.mxu1 %vm157_vm0, %v2101_v9 }
  0x8b   :  { %v480_v41 = vmul.f32 %v2107_v11, %v2107_v11  ;;  %v396_v44 = vsel %vm394_vm1, %v2107_v11, 0.0 }
  0x8c   :  { %v397_v51 = vadd.f32 %v396_v44, %v395_v48 }
  0x8d   :  { %v512_v46 = vsel %vm394_vm1, %v480_v41, 0.0  ;;  %v2244_v41 = vpop.f32.mrf.mxu3 }
  0x8e   :  { %v513_v54 = vadd.f32 %v512_v46, %v511_v50 }
  0x92   :  { %v2114_v13 = vpop.f32.mrf.mxu0 }
  0x93   :  { %v481_v43 = vmul.f32 %v2114_v13, %v2114_v13  ;;  %v398_v49 = vsel %vm394_vm1, %v2114_v13, 0.0 }
  0x94   :  { %v399_v57 = vadd.f32 %v398_v49, %v397_v51 }
  0x95   :  { %1882 = vmatmul.msk.bf16.gmra.mxu0 %vm157_vm0, %v2112_v12  ;;  %v514_v52 = vsel %vm394_vm1, %v481_v43, 0.0 }
  0x96   :  { %v515_v60 = vadd.f32 %v514_v52, %v513_v54 }
  0x9a   :  { %v2118_v14 = vpop.f32.mrf.mxu0  ;;  %1902 = vmatmul.msk.bf16.gmra.mxu1 %vm157_vm0, %v2112_v12 }
  0x9b   :  { %v482_v47 = vmul.f32 %v2118_v14, %v2118_v14  ;;  %v400_v55 = vsel %vm394_vm1, %v2118_v14, 0.0 }
  0x9c   :  { %v401_v62 = vadd.f32 %v400_v55, %v399_v57 }
  0x9d   :  { %v516_v58 = vsel %vm394_vm1, %v482_v47, 0.0 }
  0x9e   :  { %v517_v1 = vadd.f32 %v516_v58, %v515_v60 }
  0xa2   :  { %v2129_v17 = vpop.f32.mrf.mxu0 }
  0xa3   :  { %v483_v53 = vmul.f32 %v2129_v17, %v2129_v17  ;;  %v402_v61 = vsel %vm394_vm1, %v2129_v17, 0.0 }
  0xa4   :  { %v403_v19 = vadd.f32 %v402_v61, %v401_v62 }
  0xa5   :  { %1883 = vmatmul.msk.bf16.gmra.mxu0 %vm157_vm0, %v2127_v16  ;;  %v518_v63 = vsel %vm394_vm1, %v483_v53, 0.0 }
  0xaa   :  { %v2133_v18 = vpop.f32.mrf.mxu0  ;;  %1903 = vmatmul.msk.bf16.gmra.mxu1 %vm157_vm0, %v2127_v16 }
  0xab   :  { %v484_v59 = vmul.f32 %v2133_v18, %v2133_v18  ;;  %v404_v2 = vsel %vm394_vm1, %v2133_v18, 0.0 }
  0xac   :  { %v405_v42 = vadd.f32 %v404_v2, %v403_v19 }
  0xad   :  { %v520_v3 = vsel %vm394_vm1, %v484_v59, 0.0 }
  0xb2   :  { %v2144_v21 = vpop.f32.mrf.mxu0 }
  0xb3   :  { %v485_v36 = vmul.f32 %v2144_v21, %v2144_v21  ;;  %v406_v43 = vsel %vm394_vm1, %v2144_v21, 0.0 }
  0xb4   :  { %v407_v57 = vadd.f32 %v406_v43, %v405_v42 }
  0xb5   :  { %1884 = vmatmul.msk.bf16.gmra.mxu0 %vm157_vm0, %v2142_v20  ;;  %v2268_v58 = vsel %vm394_vm1, %v485_v36, 0.0 }
  0xba   :  { %v2148_v22 = vpop.f32.mrf.mxu0  ;;  %1904 = vmatmul.msk.bf16.gmra.mxu1 %vm157_vm0, %v2142_v20 }
  0xbb   :  { %v408_v48 = vsel %vm394_vm1, %v2148_v22, 0.0  ;;  %v2272_v61 = vmul.f32 %v2148_v22, %v2148_v22 }
  0xc2   :  { %v2153_v24 = vpop.f32.mrf.mxu0 }
  0xc3   :  { %3401 = vst [vmem:[#allocation2_spill] sm:$0xff] %v2153_v24  ;;  %v487_v15 = vmul.f32 %v2153_v24, %v2153_v24  ;;  %v416_v49 = vsel %vm394_vm1, %v2153_v24, 0.0 }
  0xc5   :  { %1885 = vmatmul.msk.bf16.gmra.mxu0 %vm157_vm0, %v1969_v23  ;;  %v532_v50 = vsel %vm394_vm1, %v487_v15, 0.0 }
  0xca   :  { %v2156_v25 = vpop.f32.mrf.mxu0 }
  0xcb   :  { %3402 = vst [vmem:[#allocation3_spill] sm:$0xff] %v2156_v25  ;;  %v488_v0 = vmul.f32 %v2156_v25, %v2156_v25  ;;  %v417_v44 = vsel %vm394_vm1, %v2156_v25, 0.0 }
  0xcc   :  { %v418_v59 = vadd.f32 %v417_v44, %v416_v49 }
  0xcd   :  { %v533_v46 = vsel %vm394_vm1, %v488_v0, 0.0 }
  0xce   :  { %v534_v60 = vadd.f32 %v533_v46, %v532_v50 }
  0xd2   :  { %v2161_v27 = vpop.f32.mrf.mxu0 }
  0xd3   :  { %3403 = vst [vmem:[#allocation4_spill] sm:$0xff] %v2161_v27  ;;  %v489_v23 = vmul.f32 %v2161_v27, %v2161_v27  ;;  %v419_v52 = vsel %vm394_vm1, %v2161_v27, 0.0 }
  0xd4   :  { %v420_v2 = vadd.f32 %v419_v52, %v418_v59 }
  0xd5   :  { %1886 = vmatmul.msk.bf16.gmra.mxu0 %vm157_vm0, %v1970_v26  ;;  %v519_v26 = vadd.f32 %v518_v63, %v517_v1  ;;  %v535_v53 = vsel %vm394_vm1, %v489_v23, 0.0  ;;  %v2280_v1 = vadd.f32 %v408_v48, %v407_v57 }
  0xd6   :  { %v536_v15 = vadd.f32 %v535_v53, %v534_v60  ;;  %v2306_v60 = vpop.f32.mrf.mxu3 }
  0xd7   :  { %v2251_v47 = vadd.f32 %v520_v3, %v519_v26 }
  0xda   :  { %v2164_v28 = vpop.f32.mrf.mxu0 }
  0xdb   :  { %3404 = vst [vmem:[#allocation5_spill] sm:$0xff] %v2164_v28  ;;  %v490_v54 = vmul.f32 %v2164_v28, %v2164_v28  ;;  %v421_v62 = vsel %vm394_vm1, %v2164_v28, 0.0 }
  0xdc   :  { %v422_v42 = vadd.f32 %v421_v62, %v420_v2 }
  0xdd   :  { %v537_v3 = vsel %vm394_vm1, %v490_v54, 0.0 }
  0xde   :  { %v538_v53 = vadd.f32 %v537_v3, %v536_v15 }
  0xe2   :  { %v2166_v29 = vpop.f32.mrf.mxu0 }
  0xe3   :  { %3405 = vst [vmem:[#allocation6_spill] sm:$0xff] %v2166_v29  ;;  %v491_v23 = vmul.f32 %v2166_v29, %v2166_v29  ;;  %v423_v43 = vsel %vm394_vm1, %v2166_v29, 0.0 }
  0xe4   :  { %v424_v15 = vadd.f32 %v423_v43, %v422_v42 }
  0xe5   :  { %v539_v62 = vsel %vm394_vm1, %v491_v23, 0.0 }
  0xe6   :  { %v540_v42 = vadd.f32 %v539_v62, %v538_v53 }
  0xea   :  { %v2168_v30 = vpop.f32.mrf.mxu0 }
  0xeb   :  { %3406 = vst [vmem:[#allocation7_spill] sm:$0xff] %v2168_v30  ;;  %v492_v54 = vmul.f32 %v2168_v30, %v2168_v30 }
  0xed   :  { %v541_v43 = vsel %vm394_vm1, %v492_v54, 0.0 }
  0xf2   :  { %v2170_v31 = vpop.f32.mrf.mxu0 }
  0xf3   :  { %3407 = vst [vmem:[#allocation8_spill] sm:$0xff] %v2170_v31  ;;  %v493_v23 = vmul.f32 %v2170_v31, %v2170_v31 }
  0xfa   :  { %v2172_v32 = vpop.f32.mrf.mxu0 }
  0xfb   :  { %3408 = vst [vmem:[#allocation9_spill] sm:$0xff] %v2172_v32  ;;  %v494_v53 = vmul.f32 %v2172_v32, %v2172_v32 }
 0x102   :  { %v2174_v33 = vpop.f32.mrf.mxu0 }
 0x103   :  { %v495_v63 = vmul.f32 %v2174_v33, %v2174_v33  ;;  %v437_v44 = vsel %vm394_vm1, %v2174_v33, 0.0 }
 0x105   :  { %v553_v48 = vsel %vm394_vm1, %v495_v63, 0.0 }
 0x10a   :  { %v2176_v34 = vpop.f32.mrf.mxu0 }
 0x10b   :  { %3409 = vst [vmem:[#allocation10_spill] sm:$0xff] %v2176_v34  ;;  %v496_v55 = vmul.f32 %v2176_v34, %v2176_v34  ;;  %v438_v19 = vsel %vm394_vm1, %v2176_v34, 0.0 }
 0x10c   :  { %v439_v49 = vadd.f32 %v438_v19, %v437_v44  ;;  %v425_v19 = vsel %vm394_vm1, %v2168_v30, 0.0 }
 0x10d   :  { %v554_v26 = vsel %vm394_vm1, %v496_v55, 0.0  ;;  %v426_v62 = vadd.f32 %v425_v19, %v424_v15  ;;  %v542_v15 = vadd.f32 %v541_v43, %v540_v42 }
 0x10e   :  { %v555_v55 = vadd.f32 %v554_v26, %v553_v48 }
 0x112   :  { %v2178_v35 = vpop.f32.mrf.mxu0 }
 0x113   :  { %3410 = vst [vmem:[#allocation11_spill] sm:$0xff] %v2178_v35  ;;  %v497_v0 = vmul.f32 %v2178_v35, %v2178_v35  ;;  %v440_v46 = vsel %vm394_vm1, %v2178_v35, 0.0 }
 0x114   :  { %v441_v63 = vadd.f32 %v440_v46, %v439_v49 }
 0x115   :  { %v556_v50 = vsel %vm394_vm1, %v497_v0, 0.0 }
 0x116   :  { %v557_v3 = vadd.f32 %v556_v50, %v555_v55  ;;  %v2335_v50 = vld [vmem:[%s3377_s7 + $0x8] sm:$0xff] }
 0x117   :  { %650 = vmatpush.msra.mxu3 %v2335_v50  ;;  %621 = vmatpush.msra.mxu2 %v2335_v50 }
 0x11a   :  { %v2183_v37 = vpop.f32.mrf.mxu0 }
 0x11b   :  { %3411 = vst [vmem:[#allocation12_spill] sm:$0xff] %v2183_v37  ;;  %v498_v36 = vmul.f32 %v2183_v37, %v2183_v37  ;;  %v442_v57 = vsel %vm394_vm1, %v2183_v37, 0.0 }
 0x11c   :  { %v443_v44 = vadd.f32 %v442_v57, %v441_v63  ;;  %v2346_v57 = vld [vmem:[%s3377_s7] sm:$0xff] }
 0x11d   :  { %v558_v0 = vsel %vm394_vm1, %v498_v36, 0.0  ;;  %651 = vmatpush.msra.mxu3 %v2346_v57  ;;  %622 = vmatpush.msra.mxu2 %v2346_v57 }
 0x11e   :  { %v559_v48 = vadd.f32 %v558_v0, %v557_v3 }
 0x11f   :  { %1911 = vmatpush.xpose.msk.msrb.mxu2 %vm672_vm5, %v2206_v45  ;;  %1916 = vmatpush.xpose.msk.msrb.mxu3 %vm672_vm5, %v2206_v45 }
 0x122   :  { %v2187_v38 = vpop.f32.mrf.mxu0 }
 0x123   :  { %3412 = vst [vmem:[#allocation13_spill] sm:$0xff] %v2187_v38  ;;  %v499_v52 = vmul.f32 %v2187_v38, %v2187_v38  ;;  %v444_v26 = vsel %vm394_vm1, %v2187_v38, 0.0  ;;  %1912 = vmatpush.xpose.msk.msrb.mxu2 %vm672_vm5, %v2326_v4  ;;  %1917 = vmatpush.xpose.msk.msrb.mxu3 %vm672_vm5, %v2326_v4 }
 0x124   :  { %v445_v54 = vadd.f32 %v444_v26, %v443_v44  ;;  %v543_v26 = vsel %vm394_vm1, %v493_v23, 0.0  ;;  %v524_v23 = vsel %vm394_vm1, %v2272_v61, 0.0 }
 0x125   :  { %v560_v36 = vsel %vm394_vm1, %v499_v52, 0.0  ;;  %v427_v52 = vsel %vm394_vm1, %v2170_v31, 0.0  ;;  %v544_v42 = vadd.f32 %v543_v26, %v542_v15  ;;  %v410_v26 = vrot.slane %v2280_v1, 4 }
 0x126   :  { %v561_v63 = vadd.f32 %v560_v36, %v559_v48  ;;  %v428_v19 = vadd.f32 %v427_v52, %v426_v62 }
 0x127   :  { %1913 = vmatpush.xpose.msk.msrb.mxu2 %vm672_vm5, %v2335_v50  ;;  %1918 = vmatpush.xpose.msk.msrb.mxu3 %vm672_vm5, %v2335_v50 }
 0x12a   :  { %v2189_v39 = vpop.f32.mrf.mxu0 }
 0x12b   :  { %3413 = vst [vmem:[#allocation14_spill] sm:$0xff] %v2189_v39  ;;  %v500_v2 = vmul.f32 %v2189_v39, %v2189_v39  ;;  %v446_v49 = vsel %vm394_vm1, %v2189_v39, 0.0  ;;  %1914 = vmatpush.xpose.msk.msrb.mxu2 %vm672_vm5, %v2346_v57  ;;  %1919 = vmatpush.xpose.msk.msrb.mxu3 %vm672_vm5, %v2346_v57 }
 0x12c   :  { %v447_v44 = vadd.f32 %v446_v49, %v445_v54 }
 0x12d   :  { %v562_v55 = vsel %vm394_vm1, %v500_v2, 0.0  ;;  %v429_v2 = vsel %vm394_vm1, %v2172_v32, 0.0  ;;  %v545_v32 = vsel %vm394_vm1, %v494_v53, 0.0 }
 0x12e   :  { %v563_v36 = vadd.f32 %v562_v55, %v561_v63  ;;  %v430_v43 = vadd.f32 %v429_v2, %v428_v19  ;;  %v2370_v55 = vpop.f32.mrf.mxu3 }
 0x132   :  { %v2193_v40 = vpop.f32.mrf.mxu0 }
 0x133   :  { %3414 = vst [vmem:[#allocation15_spill] sm:$0xff] %v2193_v40  ;;  %v501_v46 = vmul.f32 %v2193_v40, %v2193_v40  ;;  %v448_v0 = vsel %vm394_vm1, %v2193_v40, 0.0 }
 0x134   :  { %v449_v49 = vadd.f32 %v448_v0, %v447_v44  ;;  %v523_v0 = vadd.f32 %v2268_v58, %v2251_v47  ;;  %v411_v58 = vadd.f32 %v410_v26, %v2280_v1  ;;  %v465_v26 = vsel %vm394_vm1, %v2244_v41, 0.0 }
 0x135   :  { %v564_v31 = vsel %vm394_vm1, %v501_v46, 0.0 }
 0x136   :  { %v565_v52 = vadd.f32 %v564_v31, %v563_v36  ;;  %v546_v31 = vadd.f32 %v545_v32, %v544_v42  ;;  %v525_v19 = vadd.f32 %v524_v23, %v523_v0  ;;  %v431_v36 = vrot.slane %v430_v43, 4  ;;  %v2404_v40 = vpop.f32.mrf.mxu3 }
 0x138   :  { %v547_v32 = vrot.slane %v546_v31, 4  ;;  %v432_v1 = vadd.f32 %v431_v36, %v430_v43  ;;  %v509_v36 = vmul.f32 %v2370_v55, %v2370_v55 }
 0x13a   :  { %v2223_v56 = vpop.f32.mrf.mxu0 }
 0x13b   :  { %3415 = vst [vmem:[#allocation16_spill] sm:$0xff] %v2223_v56  ;;  %v502_v3 = vmul.f32 %v2223_v56, %v2223_v56  ;;  %v450_v48 = vsel %vm394_vm1, %v2223_v56, 0.0 }
 0x13c   :  { %v451_v62 = vadd.f32 %v450_v48, %v449_v49 }
 0x13d   :  { %v566_v54 = vsel %vm394_vm1, %v502_v3, 0.0 }
 0x13e   :  { %v567_v2 = vadd.f32 %v566_v54, %v565_v52  ;;  %v452_v49 = vrot.slane %v451_v62, 4  ;;  %v2458_v7 = vpop.f32.mrf.mxu3 }
 0x13f   :  { %3416 = vst [vmem:[#allocation17_spill] sm:$0xff] %v2458_v7 }
 0x140   :  { %v568_v28 = vrot.slane %v567_v2, 4  ;;  %v453_v0 = vadd.f32 %v452_v49, %v451_v62  ;;  %v467_v62 = vsel %vm394_vm1, %v2306_v60, 0.0 }
 0x142   :  { %v2258_v51 = vpop.f32.mrf.mxu0  ;;  %v569_v5 = vadd.f32 %v568_v28, %v567_v2  ;;  %v510_v28 = vmul.f32 %v2404_v40, %v2404_v40 }
 0x143   :  { %v503_v63 = vmul.f32 %v2258_v51, %v2258_v51  ;;  %v458_v3 = vsel %vm394_vm1, %v2258_v51, 0.0 }
 0x145   :  { %v574_v29 = vsel %vm394_vm1, %v503_v63, 0.0  ;;  %v526_v63 = vrot.slane %v525_v19, 4 }
 0x146   :  { %v2460_v8 = vpop.f32.mrf.mxu3 }
 0x147   :  { %v527_v49 = vadd.f32 %v526_v63, %v525_v19  ;;  %v471_v19 = vsel %vm394_vm1, %v2404_v40, 0.0  ;;  %3417 = vst [vmem:[#allocation18_spill] sm:$0xff] %v2460_v8 }
 0x14a   :  { %v2304_v59 = vpop.f32.mrf.mxu0 }
 0x14b   :  { %v504_v46 = vmul.f32 %v2304_v59, %v2304_v59  ;;  %v459_v61 = vsel %vm394_vm1, %v2304_v59, 0.0 }
 0x14c   :  { %v460_v48 = vadd.f32 %v459_v61, %v458_v3  ;;  %v508_v3 = vmul.f32 %v2306_v60, %v2306_v60 }
 0x14d   :  { %v575_v44 = vsel %vm394_vm1, %v504_v46, 0.0  ;;  %v507_v46 = vmul.f32 %v2244_v41, %v2244_v41 }
 0x14e   :  { %v576_v42 = vadd.f32 %v575_v44, %v574_v29  ;;  %v2462_v9 = vpop.f32.mrf.mxu3 }
 0x14f   :  { %v581_v43 = vsel %vm394_vm1, %v507_v46, 0.0  ;;  %3418 = vst [vmem:[#allocation19_spill] sm:$0xff] %v2462_v9 }
 0x152   :  { %v2360_v30 = vpop.f32.mrf.mxu0 }
 0x153   :  { %v505_v53 = vmul.f32 %v2360_v30, %v2360_v30  ;;  %v461_v15 = vsel %vm394_vm1, %v2360_v30, 0.0 }
 0x154   :  { %v462_v52 = vadd.f32 %v461_v15, %v460_v48  ;;  %v412_v15 = vrot.slane %v411_v58, 2  ;;  %v548_v48 = vadd.f32 %v547_v32, %v546_v31  ;;  %v583_v31 = vsel %vm394_vm1, %v508_v3, 0.0 }
 0x155   :  { %v577_v47 = vsel %vm394_vm1, %v505_v53, 0.0  ;;  %v469_v32 = vsel %vm394_vm1, %v2370_v55, 0.0 }
 0x156   :  { %v578_v53 = vadd.f32 %v577_v47, %v576_v42  ;;  %v433_v47 = vrot.slane %v432_v1, 2  ;;  %v549_v2 = vrot.slane %v548_v48, 2  ;;  %v413_v3 = vadd.f32 %v412_v15, %v411_v58 }
 0x15a   :  { %v2389_v54 = vpop.f32.mrf.mxu0 }
 0x15b   :  { %v463_v23 = vsel %vm394_vm1, %v2389_v54, 0.0  ;;  %v506_v61 = vmul.f32 %v2389_v54, %v2389_v54 }
 0x15c   :  { %v464_v29 = vadd.f32 %v463_v23, %v462_v52  ;;  %v454_v23 = vrot.slane %v453_v0, 2 }
 0x15d   :  { %v579_v44 = vsel %vm394_vm1, %v506_v61, 0.0 }
 0x15e   :  { %v466_v27 = vadd.f32 %v465_v26, %v464_v29  ;;  %v580_v56 = vadd.f32 %v579_v44, %v578_v53  ;;  %v570_v53 = vrot.slane %v569_v5, 2  ;;  %v585_v29 = vsel %vm394_vm1, %v509_v36, 0.0 }
 0x15f   :  { %v455_v44 = vadd.f32 %v454_v23, %v453_v0  ;;  %v414_v36 = vrot.slane %v413_v3, 1 }
 0x160   :  { %v468_v42 = vadd.f32 %v467_v62, %v466_v27  ;;  %v582_v52 = vadd.f32 %v581_v43, %v580_v56  ;;  %v528_v27 = vrot.slane %v527_v49, 2  ;;  %v434_v56 = vadd.f32 %v433_v47, %v432_v1 }
 0x161   :  { %v587_v43 = vsel %vm394_vm1, %v510_v28, 0.0  ;;  %v550_v62 = vadd.f32 %v549_v2, %v548_v48  ;;  %v571_v37 = vadd.f32 %v570_v53, %v569_v5  ;;  %v456_v35 = vrot.slane %v455_v44, 1 }
 0x162   :  { %v584_v46 = vadd.f32 %v583_v31, %v582_v52  ;;  %v470_v61 = vadd.f32 %v469_v32, %v468_v42  ;;  %v529_v52 = vadd.f32 %v528_v27, %v527_v49  ;;  %v435_v42 = vrot.slane %v434_v56, 1 }
 0x163   :  { %v551_v25 = vrot.slane %v550_v62, 1  ;;  %v572_v1 = vrot.slane %v571_v37, 1  ;;  %v415_v47 = vadd.f32 %v414_v36, %v413_v3  ;;  %v457_v23 = vadd.f32 %v456_v35, %v455_v44  ;;  %v2464_v35 = vpop.f32.mrf.mxu3  ;;  %v1981_v36 = vld [vmem:[%s3378_s2] ss:$0 sm:$0xff] }
 0x164   :  { %v472_v63 = vadd.f32 %v471_v19, %v470_v61  ;;  %v586_v26 = vadd.f32 %v585_v29, %v584_v46  ;;  %v530_v58 = vrot.slane %v529_v52, 1  ;;  %v436_v0 = vadd.f32 %v435_v42, %v434_v56  ;;  %3419 = vst [vmem:[#allocation20_spill] sm:$0xff] %v2464_v35  ;;  %v2887_v35 = vpop.f32.mrf.mxu1 }
 0x165   :  { %v552_v5 = vadd.f32 %v551_v25, %v550_v62  ;;  %v573_v28 = vadd.f32 %v572_v1, %v571_v37 }
 0x166   :  { %v473_v39 = vrot.slane %v472_v63, 4  ;;  %v588_v38 = vadd.f32 %v587_v43, %v586_v26  ;;  %v531_v2 = vadd.f32 %v530_v58, %v529_v52 }
 0x168   :  { %v474_v31 = vadd.f32 %v473_v39, %v472_v63  ;;  %v589_v32 = vrot.slane %v588_v38, 4 }
 0x16a   :  { %v475_v24 = vrot.slane %v474_v31, 2  ;;  %v590_v34 = vadd.f32 %v589_v32, %v588_v38  ;;  %v600_v38 = vsel %vm599_vm2, %v436_v0, %v415_v47  ;;  %v1975_v32 = vld [vmem:[%s3380_s4] sm:$0xff] }
 0x16b   :  { %v602_v6 = vsel %vm601_vm3, %v457_v23, %v600_v38  ;;  %v1982_v0 = vld [vmem:[%s3379_s3] ss:$0 sm:$0xff] }
 0x16c   :  { %v591_v15 = vrot.slane %v590_v34, 2  ;;  %v476_v48 = vadd.f32 %v475_v24, %v474_v31  ;;  %v631_v24 = vsel %vm599_vm2, %v552_v5, %v531_v2  ;;  %v1976_v31 = vld [vmem:[%s3380_s4 + $0x8] sm:$0xff] }
 0x16d   :  { %v632_v25 = vsel %vm601_vm3, %v573_v28, %v631_v24 }
 0x16e   :  { %v592_v49 = vadd.f32 %v591_v15, %v590_v34  ;;  %v477_v39 = vrot.slane %v476_v48, 1 }
 0x170   :  { %v478_v46 = vadd.f32 %v477_v39, %v476_v48  ;;  %v593_v61 = vrot.slane %v592_v49, 1 }
 0x172   :  { %v604_v53 = vsel %vm603_vm4, %v478_v46, %v602_v6  ;;  %v594_v29 = vadd.f32 %v593_v61, %v592_v49 }
 0x173   :  { %1909 = vmatmul.msk.f32.vlgmr.msra.gmra.mxu2 %vm394_vm1, %v604_v53 }
 0x174   :  { %v633_v34 = vsel %vm603_vm4, %v594_v29, %v632_v25  ;;  %1106 = vmatpush.bf16.msra.mxu2 %v1976_v31 }
 0x175   :  { %1910 = vmatmul.msk.f32.vlgmr.msra.gmra.mxu3 %vm394_vm1, %v633_v34 }
 0x176   :  { %1979 = vmatpush.bf16.msra.mxu3 %v1976_v31 }
 0x178   :  { %1107 = vmatpush.bf16.msra.mxu2 %v1975_v32 }
 0x17a   :  { %1980 = vmatpush.bf16.msra.mxu3 %v1975_v32 }
 0x1f6   :  { %v624_v37 = vpop.f32.mrf.mxu2 }
 0x1f7   :  { %v656_v19 = vmul.f32 0.00390625, %v624_v37 }
 0x1f8   :  { %v653_v27 = vpop.f32.mrf.mxu3 }
 0x1f9   :  { %v658_v56 = vmul.f32 %v656_v19, %v656_v19  ;;  %v657_v63 = vmul.f32 0.00390625, %v653_v27  ;;  %1915 = vmatmul.msk.f32.vlgmr.msrb.gmra.mxu2 %vm672_vm5, %v656_v19 }
 0x1fb   :  { %v659_v12 = vsub.f32 %v657_v63, %v658_v56 }
 0x1fd   :  { %v660_v16 = vmax.f32 %v659_v12, 0.0 }
 0x1ff   :  { %v661_v26 = vadd.f32 1e-05, %v660_v16 }
 0x201   :  { %1985 = vrsqrt.f32 %v661_v26  ;;  %vm668_vm7 = vweird.f32 %v661_v26 }
 0x207   :  { %v1986_v20 = vpop.eup %1985 }
 0x208   :  { %v663_v3 = vmul.f32 %v1986_v20, %v661_v26  ;;  %vm669_vm6 = vweird.f32 %v1986_v20 }
 0x209   :  { %vm670_vm8 = vmor %vm668_vm7, %vm669_vm6 }
 0x20a   :  { %v664_v44 = vmul.f32 %v1986_v20, %v663_v3 }
 0x20c   :  { %v665_v43 = vmul.f32 0.5, %v664_v44 }
 0x20e   :  { %v666_v62 = vsub.f32 1.5, %v665_v43 }
 0x210   :  { %v667_v52 = vmul.f32 %v1986_v20, %v666_v62 }
 0x212   :  { %v671_v42 = vsel %vm670_vm8, %v1986_v20, %v667_v52 }
 0x213   :  { %1920 = vmatmul.msk.f32.vlgmr.msrb.gmra.mxu3 %vm672_vm5, %v671_v42 }
 0x214   :  { %1412 = vmatpush.msrb.mxu3 %v2206_v45 }
 0x216   :  { %1413 = vmatpush.msrb.mxu3 %v2326_v4 }
 0x218   :  { %1414 = vmatpush.msrb.mxu3 %v2335_v50 }
 0x21a   :  { %1415 = vmatpush.msrb.mxu3 %v2346_v57 }
 0x27c   :  { %v705_v15 = vpop.f32.mrf.mxu2 }
 0x296   :  { %v728_v1 = vpop.f32.mrf.mxu3 }
 0x297   :  { %v2481_v58 = vmul.f32 %v1981_v36, %v728_v1 }
 0x299   :  { %v735_v48 = vmul.f32 %v2481_v58, %v705_v15  ;;  %v743_v47 = vrot.slane %v2481_v58, 3  ;;  %v2489_v23 = vperm.slane %v2481_v58, 0 }
 0x29b   :  { %v2491_v5 = vsub.f32 %v1982_v0, %v735_v48  ;;  %v2493_v49 = vperm.slane %v743_v47, 0  ;;  %v752_v2 = vmul.f32 %v2489_v23, %v2103_v10  ;;  %v753_v46 = vmul.f32 %v2489_v23, %v2107_v11 }
 0x29c   :  { %v754_v34 = vmul.f32 %v2489_v23, %v2114_v13  ;;  %v755_v37 = vmul.f32 %v2489_v23, %v2118_v14 }
 0x29d   :  { %v787_v39 = vrot.slane %v2491_v5, 3  ;;  %v2497_v28 = vperm.slane %v2491_v5, 0  ;;  %v776_v6 = vmul.f32 %v2493_v49, %v2258_v51  ;;  %v777_v53 = vmul.f32 %v2493_v49, %v2304_v59 }
 0x29e   :  { %v778_v63 = vmul.f32 %v2493_v49, %v2360_v30  ;;  %v779_v13 = vmul.f32 %v2493_v49, %v2389_v54 }
 0x29f   :  { %v2503_v38 = vperm.slane %v787_v39, 0  ;;  %v796_v61 = vadd.f32 %v2497_v28, %v752_v2  ;;  %v797_v29 = vadd.f32 %v2497_v28, %v753_v46  ;;  %v798_v26 = vadd.f32 %v2497_v28, %v754_v34 }
 0x2a0   :  { %v799_v44 = vadd.f32 %v2497_v28, %v755_v37  ;;  %v756_v46 = vmul.f32 %v2489_v23, %v2129_v17 }
 0x2a1   :  { %vm828_vm9 = vcmp.gt.f32.partialorder %v796_v61, 0.0  ;;  %v860_v24 = vmul.f32 0.2, %v796_v61  ;;  %v820_v25 = vadd.f32 %v2503_v38, %v776_v6  ;;  %v821_v10 = vadd.f32 %v2503_v38, %v777_v53 }
 0x2a2   :  { %vm829_vm10 = vcmp.gt.f32.partialorder %v797_v29, 0.0  ;;  %v861_v11 = vmul.f32 0.2, %v797_v29  ;;  %v822_v42 = vadd.f32 %v2503_v38, %v778_v63  ;;  %v823_v31 = vadd.f32 %v2503_v38, %v779_v13 }
 0x2a3   :  { %v892_v51 = vsel %vm828_vm9, %v796_v61, %v860_v24  ;;  %vm852_vm11 = vcmp.gt.f32.partialorder %v820_v25, 0.0  ;;  %vm853_vm12 = vcmp.gt.f32.partialorder %v821_v10, 0.0  ;;  %v884_v59 = vmul.f32 0.2, %v820_v25 }
 0x2a4   :  { %v893_v19 = vsel %vm829_vm10, %v797_v29, %v861_v11  ;;  %v924_v27 = vpack.c.bf16 %v892_v51, %v892_v51  ;;  %v885_v56 = vmul.f32 0.2, %v821_v10  ;;  %v862_v36 = vmul.f32 0.2, %v798_v26 }
 0x2a5   :  { %v925_v12 = vpack.c.bf16 %v893_v19, %v893_v19  ;;  %v916_v16 = vsel %vm852_vm11, %v820_v25, %v884_v59  ;;  %v863_v1 = vmul.f32 0.2, %v799_v44  ;;  %vm830_vm13 = vcmp.gt.f32.partialorder %v798_v26, 0.0 }
 0x2a6   :  { %v992_v20 = vunpack.c.l.b16 %v924_v27  ;;  %v917_v3 = vsel %vm853_vm12, %v821_v10, %v885_v56  ;;  %v948_v14 = vpack.c.bf16 %v916_v16, %v916_v16  ;;  %vm831_vm14 = vcmp.gt.f32.partialorder %v799_v44, 0.0 }
 0x2a7   :  { %v993_v43 = vunpack.c.l.b16 %v925_v12  ;;  %v949_v62 = vpack.c.bf16 %v917_v3, %v917_v3  ;;  %v886_v54 = vmul.f32 0.2, %v822_v42  ;;  %v887_v15 = vmul.f32 0.2, %v823_v31 }
 0x2a8   :  { %v1016_v52 = vunpack.c.l.b16 %v948_v14  ;;  %vm854_vm15 = vcmp.gt.f32.partialorder %v822_v42, 0.0  ;;  %vm855_vm6 = vcmp.gt.f32.partialorder %v823_v31, 0.0  ;;  %v894_v48 = vsel %vm830_vm13, %v798_v26, %v862_v36 }
 0x2a9   :  { %v1024_v30 = vpack.c.b16 %v993_v43, %v992_v20  ;;  %v1017_v32 = vunpack.c.l.b16 %v949_v62  ;;  %v895_v47 = vsel %vm831_vm14, %v799_v44, %v863_v1  ;;  %v918_v39 = vsel %vm854_vm15, %v822_v42, %v886_v54 }
 0x2aa   :  { %v919_v2 = vsel %vm855_vm6, %v823_v31, %v887_v15  ;;  %v757_v61 = vmul.f32 %v2489_v23, %v2133_v18  ;;  %v926_v6 = vpack.c.bf16 %v894_v48, %v894_v48  ;;  %v927_v53 = vpack.c.bf16 %v895_v47, %v895_v47 }
 0x2ab   :  { %1929 = vmatmul.msk.bf16.vlgmr.msra.gmra.mxu2 %vm394_vm1, %v1024_v30  ;;  %v1036_v0 = vpack.c.b16 %v1017_v32, %v1016_v52  ;;  %v800_v29 = vadd.f32 %v2497_v28, %v756_v46  ;;  %v780_v25 = vmul.f32 %v2493_v49, %v2244_v41  ;;  %v950_v17 = vpack.c.bf16 %v918_v39, %v918_v39 }
 0x2ac   :  { %v801_v24 = vadd.f32 %v2497_v28, %v757_v61  ;;  %v951_v10 = vpack.c.bf16 %v919_v2, %v919_v2  ;;  %v994_v11 = vunpack.c.l.b16 %v926_v6  ;;  %v995_v34 = vunpack.c.l.b16 %v927_v53 }
 0x2ad   :  { %1941 = vmatmul.msk.bf16.vlgmr.msra.gmra.mxu3 %vm394_vm1, %v1036_v0  ;;  %v824_v18 = vadd.f32 %v2503_v38, %v780_v25  ;;  %v864_v37 = vmul.f32 0.2, %v800_v29  ;;  %v1018_v59 = vunpack.c.l.b16 %v950_v17  ;;  %vm832_vm7 = vcmp.gt.f32.partialorder %v800_v29, 0.0  ;;  %v3422_v25 = vld [vmem:[#allocation3_spill] sm:$0xff] }
 0x2ae   :  { %1441 = vmatpush.msra.mxu3 %v2206_v45  ;;  %v781_v45 = vmul.f32 %v2493_v49, %v2306_v60  ;;  %v865_v51 = vmul.f32 0.2, %v801_v24  ;;  %v1019_v19 = vunpack.c.l.b16 %v951_v10  ;;  %vm833_vm8 = vcmp.gt.f32.partialorder %v801_v24, 0.0 }
 0x2af   :  { %v888_v41 = vmul.f32 0.2, %v824_v18  ;;  %v1025_v27 = vpack.c.b16 %v995_v34, %v994_v11  ;;  %vm856_vm9 = vcmp.gt.f32.partialorder %v824_v18, 0.0  ;;  %v896_v56 = vsel %vm832_vm7, %v800_v29, %v864_v37  ;;  %v3423_v34 = vld [vmem:[#allocation11_spill] sm:$0xff] }
 0x2b0   :  { %1442 = vmatpush.msra.mxu3 %v2326_v4  ;;  %v825_v4 = vadd.f32 %v2503_v38, %v781_v45  ;;  %v897_v63 = vsel %vm833_vm8, %v801_v24, %v865_v51  ;;  %v1037_v12 = vpack.c.b16 %v1019_v19, %v1018_v59  ;;  %v759_v16 = vmul.f32 %v2489_v23, %v2148_v22  ;;  %v3421_v24 = vld [vmem:[#allocation2_spill] sm:$0xff]  ;;  %v3424_v59 = vld [vmem:[#allocation12_spill] sm:$0xff] }
 0x2b1   :  { %v920_v26 = vsel %vm856_vm9, %v824_v18, %v888_v41  ;;  %v928_v20 = vpack.c.bf16 %v896_v56, %v896_v56  ;;  %v929_v3 = vpack.c.bf16 %v897_v63, %v897_v63  ;;  %v742_v44 = vrot.slane %v2481_v58, 2 }
 0x2b2   :  { %1443 = vmatpush.msra.mxu3 %v2335_v50  ;;  %v889_v60 = vmul.f32 0.2, %v825_v4  ;;  %v758_v50 = vmul.f32 %v2489_v23, %v2144_v21  ;;  %vm857_vm10 = vcmp.gt.f32.partialorder %v825_v4, 0.0  ;;  %v803_v21 = vadd.f32 %v2497_v28, %v759_v16 }
 0x2b3   :  { %v952_v43 = vpack.c.bf16 %v920_v26, %v920_v26  ;;  %v741_v52 = vrot.slane %v2481_v58, 1  ;;  %v785_v42 = vrot.slane %v2491_v5, 1  ;;  %v782_v22 = vmul.f32 %v2493_v49, %v2370_v55 }
 0x2b4   :  { %1444 = vmatpush.msra.mxu3 %v2346_v57  ;;  %v802_v57 = vadd.f32 %v2497_v28, %v758_v50  ;;  %v921_v13 = vsel %vm857_vm10, %v825_v4, %v889_v60  ;;  %v786_v23 = vrot.slane %v2491_v5, 2  ;;  %v996_v31 = vunpack.c.l.b16 %v928_v20 }
 0x2b5   :  { %v953_v62 = vpack.c.bf16 %v921_v13, %v921_v13  ;;  %v997_v30 = vunpack.c.l.b16 %v929_v3  ;;  %v867_v32 = vmul.f32 0.2, %v803_v21  ;;  %vm835_vm12 = vcmp.gt.f32.partialorder %v803_v21, 0.0 }
 0x2b6   :  { %v866_v14 = vmul.f32 0.2, %v802_v57  ;;  %vm834_vm11 = vcmp.gt.f32.partialorder %v802_v57, 0.0  ;;  %v783_v36 = vmul.f32 %v2493_v49, %v2404_v40  ;;  %v826_v1 = vadd.f32 %v2503_v38, %v782_v22  ;;  %v3420_v49 = vld [vmem:[#allocation10_spill] sm:$0xff] }
 0x2b7   :  { %v2560_v0 = vperm.slane %v742_v44, 0  ;;  %v1020_v58 = vunpack.c.l.b16 %v952_v43  ;;  %v1021_v54 = vunpack.c.l.b16 %v953_v62  ;;  %v2562_v15 = vperm.slane %v741_v52, 0  ;;  %v3426_v62 = vld [vmem:[#allocation14_spill] sm:$0xff] }
 0x2b8   :  { %v898_v28 = vsel %vm834_vm11, %v802_v57, %v866_v14  ;;  %v827_v55 = vadd.f32 %v2503_v38, %v783_v36  ;;  %v2565_v48 = vperm.slane %v786_v23, 0  ;;  %v899_v5 = vsel %vm835_vm12, %v803_v21, %v867_v32 }
 0x2b9   :  { %v930_v47 = vpack.c.bf16 %v898_v28, %v898_v28  ;;  %v2567_v39 = vperm.slane %v785_v42, 0  ;;  %v1026_v2 = vpack.c.b16 %v997_v30, %v996_v31  ;;  %v890_v46 = vmul.f32 0.2, %v826_v1  ;;  %v3427_v30 = vld [vmem:[#allocation15_spill] sm:$0xff] }
 0x2ba   :  { %v1038_v61 = vpack.c.b16 %v1021_v54, %v1020_v58  ;;  %vm858_vm13 = vcmp.gt.f32.partialorder %v826_v1, 0.0  ;;  %v768_v40 = vmul.f32 %v2560_v0, %v2174_v33  ;;  %v769_v6 = vmul.f32 %v2560_v0, %v3420_v49 }
 0x2bb   :  { %1930 = vmatmul.msk.bf16.gmra.mxu2 %vm394_vm1, %v1025_v27  ;;  %v931_v53 = vpack.c.bf16 %v899_v5, %v899_v5  ;;  %v891_v29 = vmul.f32 0.2, %v827_v55  ;;  %v760_v38 = vmul.f32 %v2562_v15, %v3421_v24  ;;  %v761_v45 = vmul.f32 %v2562_v15, %v3422_v25 }
 0x2bc   :  { %v2577_v17 = vunpack.c.l.b16 %v930_v47  ;;  %vm859_vm14 = vcmp.gt.f32.partialorder %v827_v55, 0.0  ;;  %v812_v10 = vadd.f32 %v2565_v48, %v768_v40  ;;  %v813_v18 = vadd.f32 %v2565_v48, %v769_v6 }
 0x2bd   :  { %1942 = vmatmul.msk.bf16.gmra.mxu3 %vm394_vm1, %v1037_v12  ;;  %v922_v4 = vsel %vm858_vm13, %v826_v1, %v890_v46  ;;  %v2582_v33 = vadd.f32 %v2567_v39, %v760_v38  ;;  %v2585_v11 = vadd.f32 %v2567_v39, %v761_v45  ;;  %v770_v37 = vmul.f32 %v2560_v0, %v3423_v34  ;;  %v3425_v12 = vld [vmem:[#allocation13_spill] sm:$0xff] }
 0x2be   :  { %vm844_vm15 = vcmp.gt.f32.partialorder %v812_v10, 0.0  ;;  %vm845_vm6 = vcmp.gt.f32.partialorder %v813_v18, 0.0  ;;  %v876_v51 = vmul.f32 0.2, %v812_v10  ;;  %v771_v19 = vmul.f32 %v2560_v0, %v3424_v59 }
 0x2bf   :  { %v999_v41 = vunpack.c.l.b16 %v931_v53  ;;  %v923_v60 = vsel %vm859_vm14, %v827_v55, %v891_v29  ;;  %v877_v50 = vmul.f32 0.2, %v813_v18  ;;  %v814_v27 = vadd.f32 %v2565_v48, %v770_v37  ;;  %v3428_v55 = vld [vmem:[#allocation16_spill] sm:$0xff] }
 0x2c0   :  { %v954_v56 = vpack.c.bf16 %v922_v4, %v922_v4  ;;  %v908_v63 = vsel %vm844_vm15, %v812_v10, %v876_v51  ;;  %v815_v57 = vadd.f32 %v2565_v48, %v771_v19  ;;  %v772_v16 = vmul.f32 %v2560_v0, %v3425_v12  ;;  %v3429_v12 = vld [vmem:[#allocation4_spill] sm:$0xff] }
 0x2c1   :  { %v909_v26 = vsel %vm845_vm6, %v813_v18, %v877_v50  ;;  %v940_v13 = vpack.c.bf16 %v908_v63, %v908_v63  ;;  %vm846_vm7 = vcmp.gt.f32.partialorder %v814_v27, 0.0  ;;  %v878_v20 = vmul.f32 0.2, %v814_v27 }
 0x2c2   :  { %v955_v3 = vpack.c.bf16 %v923_v60, %v923_v60  ;;  %v941_v21 = vpack.c.bf16 %v909_v26, %v909_v26  ;;  %vm847_vm8 = vcmp.gt.f32.partialorder %v815_v57, 0.0  ;;  %v879_v14 = vmul.f32 0.2, %v815_v57  ;;  %v3430_v26 = vld [vmem:[#allocation5_spill] sm:$0xff] }
 0x2c3   :  { %v2597_v44 = vunpack.c.l.b16 %v940_v13  ;;  %v910_v43 = vsel %vm846_vm7, %v814_v27, %v878_v20  ;;  %v773_v52 = vmul.f32 %v2560_v0, %v3426_v62  ;;  %v816_v42 = vadd.f32 %v2565_v48, %v772_v16 }
 0x2c4   :  { %v2602_v22 = vunpack.c.l.b16 %v941_v21  ;;  %v911_v23 = vsel %vm847_vm8, %v815_v57, %v879_v14  ;;  %v942_v31 = vpack.c.bf16 %v910_v43, %v910_v43  ;;  %v774_v32 = vmul.f32 %v2560_v0, %v3427_v30 }
 0x2c5   :  { %v943_v28 = vpack.c.bf16 %v911_v23, %v911_v23  ;;  %v817_v36 = vadd.f32 %v2565_v48, %v773_v52  ;;  %vm848_vm9 = vcmp.gt.f32.partialorder %v816_v42, 0.0  ;;  %v880_v1 = vmul.f32 0.2, %v816_v42 }
 0x2c6   :  { %v1032_v58 = vpack.c.b16 %v2602_v22, %v2597_v44  ;;  %v2609_v54 = vunpack.c.l.b16 %v942_v31  ;;  %v775_v5 = vmul.f32 %v2560_v0, %v3428_v55  ;;  %v818_v47 = vadd.f32 %v2565_v48, %v774_v32  ;;  %v3431_v31 = vld [vmem:[#allocation6_spill] sm:$0xff]  ;;  %v3432_v32 = vld [vmem:[#allocation7_spill] sm:$0xff] }
 0x2c7   :  { %vm849_vm10 = vcmp.gt.f32.partialorder %v817_v36, 0.0  ;;  %v881_v46 = vmul.f32 0.2, %v817_v36  ;;  %v1022_v53 = vunpack.c.l.b16 %v954_v56  ;;  %v1023_v29 = vunpack.c.l.b16 %v955_v3 }
 0x2c8   :  { %v819_v49 = vadd.f32 %v2565_v48, %v775_v5  ;;  %vm850_vm11 = vcmp.gt.f32.partialorder %v818_v47, 0.0  ;;  %v882_v6 = vmul.f32 0.2, %v818_v47  ;;  %v1027_v18 = vpack.c.b16 %v999_v41, %v2577_v17 }
 0x2c9   :  { %v913_v38 = vsel %vm849_vm10, %v817_v36, %v881_v46  ;;  %vm836_vm13 = vcmp.gt.f32.partialorder %v2582_v33, 0.0  ;;  %v868_v37 = vmul.f32 0.2, %v2582_v33  ;;  %v869_v51 = vmul.f32 0.2, %v2585_v11 }
 0x2ca   :  { %v945_v25 = vpack.c.bf16 %v913_v38, %v913_v38  ;;  %vm851_vm12 = vcmp.gt.f32.partialorder %v819_v49, 0.0  ;;  %v883_v45 = vmul.f32 0.2, %v819_v49  ;;  %v914_v10 = vsel %vm850_vm11, %v818_v47, %v882_v6 }
 0x2cb   :  { %1931 = vmatmul.msk.bf16.gmra.mxu2 %vm394_vm1, %v1026_v2  ;;  %v2614_v2 = vunpack.c.l.b16 %v943_v28  ;;  %v946_v48 = vpack.c.bf16 %v914_v10, %v914_v10  ;;  %v1039_v19 = vpack.c.b16 %v1023_v29, %v1022_v53  ;;  %vm837_vm14 = vcmp.gt.f32.partialorder %v2585_v11, 0.0  ;;  %v3433_v29 = vld [vmem:[#allocation8_spill] sm:$0xff] }
 0x2cc   :  { %v2622_v4 = vunpack.c.l.b16 %v945_v25  ;;  %v915_v34 = vsel %vm851_vm12, %v819_v49, %v883_v45  ;;  %v900_v50 = vsel %vm836_vm13, %v2582_v33, %v868_v37  ;;  %v901_v27 = vsel %vm837_vm14, %v2585_v11, %v869_v51  ;;  %v3434_v25 = vld [vmem:[#allocation9_spill] sm:$0xff] }
 0x2cd   :  { %1943 = vmatmul.msk.bf16.gmra.mxu3 %vm394_vm1, %v1038_v61  ;;  %v912_v61 = vsel %vm848_vm9, %v816_v42, %v880_v1  ;;  %v1033_v24 = vpack.c.b16 %v2614_v2, %v2609_v54  ;;  %v947_v59 = vpack.c.bf16 %v915_v34, %v915_v34  ;;  %v2631_v17 = vunpack.c.l.b16 %v946_v48 }
 0x2ce   :  { %v944_v40 = vpack.c.bf16 %v912_v61, %v912_v61  ;;  %v932_v63 = vpack.c.bf16 %v900_v50, %v900_v50  ;;  %v933_v57 = vpack.c.bf16 %v901_v27, %v901_v27  ;;  %v762_v16 = vmul.f32 %v2562_v15, %v3429_v12 }
 0x2cf   :  { %v2633_v41 = vunpack.c.l.b16 %v947_v59  ;;  %v763_v13 = vmul.f32 %v2562_v15, %v3430_v26  ;;  %v764_v30 = vmul.f32 %v2562_v15, %v3431_v31  ;;  %v765_v28 = vmul.f32 %v2562_v15, %v3432_v32 }
 0x2d0   :  { %v2619_v0 = vunpack.c.l.b16 %v944_v40  ;;  %v1000_v20 = vunpack.c.l.b16 %v932_v63  ;;  %v1001_v3 = vunpack.c.l.b16 %v933_v57  ;;  %v806_v21 = vadd.f32 %v2567_v39, %v762_v16 }
 0x2d1   :  { %v1035_v56 = vpack.c.b16 %v2633_v41, %v2631_v17  ;;  %v807_v14 = vadd.f32 %v2567_v39, %v763_v13  ;;  %v808_v55 = vadd.f32 %v2567_v39, %v764_v30  ;;  %v809_v5 = vadd.f32 %v2567_v39, %v765_v28 }
 0x2d2   :  { %v1034_v60 = vpack.c.b16 %v2622_v4, %v2619_v0  ;;  %v1028_v33 = vpack.c.b16 %v1001_v3, %v1000_v20  ;;  %v870_v43 = vmul.f32 0.2, %v806_v21  ;;  %vm838_vm15 = vcmp.gt.f32.partialorder %v806_v21, 0.0 }
 0x2d3   :  { %v871_v11 = vmul.f32 0.2, %v807_v14  ;;  %vm839_vm6 = vcmp.gt.f32.partialorder %v807_v14, 0.0  ;;  %v872_v46 = vmul.f32 0.2, %v808_v55  ;;  %vm840_vm7 = vcmp.gt.f32.partialorder %v808_v55, 0.0 }
 0x2d4   :  { %v902_v62 = vsel %vm838_vm15, %v806_v21, %v870_v43  ;;  %v873_v61 = vmul.f32 0.2, %v809_v5  ;;  %vm841_vm8 = vcmp.gt.f32.partialorder %v809_v5, 0.0  ;;  %v766_v38 = vmul.f32 %v2562_v15, %v3433_v29 }
 0x2d5   :  { %v903_v52 = vsel %vm839_vm6, %v807_v14, %v871_v11  ;;  %v934_v42 = vpack.c.bf16 %v902_v62, %v902_v62  ;;  %v904_v40 = vsel %vm840_vm7, %v808_v55, %v872_v46  ;;  %v767_v45 = vmul.f32 %v2562_v15, %v3434_v25 }
 0x2d6   :  { %v935_v23 = vpack.c.bf16 %v903_v52, %v903_v52  ;;  %v905_v49 = vsel %vm841_vm8, %v809_v5, %v873_v61  ;;  %v936_v6 = vpack.c.bf16 %v904_v40, %v904_v40  ;;  %v810_v34 = vadd.f32 %v2567_v39, %v766_v38 }
 0x2d7   :  { %v1002_v36 = vunpack.c.l.b16 %v934_v42  ;;  %v937_v53 = vpack.c.bf16 %v905_v49, %v905_v49  ;;  %v811_v48 = vadd.f32 %v2567_v39, %v767_v45 }
 0x2d8   :  { %v1003_v1 = vunpack.c.l.b16 %v935_v23  ;;  %v1004_v10 = vunpack.c.l.b16 %v936_v6  ;;  %v874_v51 = vmul.f32 0.2, %v810_v34  ;;  %vm842_vm9 = vcmp.gt.f32.partialorder %v810_v34, 0.0 }
 0x2d9   :  { %v875_v59 = vmul.f32 0.2, %v811_v48  ;;  %vm843_vm10 = vcmp.gt.f32.partialorder %v811_v48, 0.0 }
 0x2da   :  { %v1029_v47 = vpack.c.b16 %v1003_v1, %v1002_v36 }
 0x2db   :  { %1932 = vmatmul.msk.bf16.gmra.mxu2 %vm394_vm1, %v1027_v18  ;;  %v1005_v18 = vunpack.c.l.b16 %v937_v53  ;;  %v907_v50 = vsel %vm843_vm10, %v811_v48, %v875_v59 }
 0x2dc   :  { %v939_v63 = vpack.c.bf16 %v907_v50, %v907_v50 }
 0x2dd   :  { %1944 = vmatmul.msk.bf16.gmra.mxu3 %vm394_vm1, %v1039_v19  ;;  %v1030_v37 = vpack.c.b16 %v1005_v18, %v1004_v10  ;;  %v906_v19 = vsel %vm842_vm9, %v810_v34, %v874_v51 }
 0x2de   :  { %v938_v27 = vpack.c.bf16 %v906_v19, %v906_v19  ;;  %v1007_v12 = vunpack.c.l.b16 %v939_v63 }
 0x2e0   :  { %v1006_v57 = vunpack.c.l.b16 %v938_v27 }
 0x2e2   :  { %v1031_v15 = vpack.c.b16 %v1007_v12, %v1006_v57 }
 0x2eb   :  { %1933 = vmatmul.msk.bf16.gmra.mxu2 %vm394_vm1, %v1028_v33 }
 0x2fb   :  { %1934 = vmatmul.msk.bf16.gmra.mxu2 %vm394_vm1, %v1029_v47 }
 0x30b   :  { %1935 = vmatmul.msk.bf16.gmra.mxu2 %vm394_vm1, %v1030_v37 }
 0x31b   :  { %1936 = vmatmul.msk.bf16.gmra.mxu2 %vm394_vm1, %v1031_v15 }
 0x32b   :  { %1937 = vmatmul.msk.bf16.gmra.mxu2 %vm394_vm1, %v1032_v58 }
 0x32e   :  { %v2666_v39 = vpop.f32.mrf.mxu2 }
 0x32f   :  { %v1275_v42 = vmul.f32 %v2666_v39, %v2666_v39  ;;  %v1191_v46 = vsel %vm394_vm1, %v2666_v39, 0.0 }
 0x331   :  { %v1307_v61 = vsel %vm394_vm1, %v1275_v42, 0.0 }
 0x336   :  { %v2668_v16 = vpop.f32.mrf.mxu2 }
 0x337   :  { %v1276_v62 = vmul.f32 %v2668_v16, %v2668_v16  ;;  %v1192_v32 = vsel %vm394_vm1, %v2668_v16, 0.0 }
 0x338   :  { %v1193_v6 = vadd.f32 %v1192_v32, %v1191_v46 }
 0x339   :  { %v1308_v28 = vsel %vm394_vm1, %v1276_v62, 0.0 }
 0x33a   :  { %v1309_v25 = vadd.f32 %v1308_v28, %v1307_v61 }
 0x33b   :  { %1938 = vmatmul.msk.bf16.gmra.mxu2 %vm394_vm1, %v1033_v24 }
 0x33e   :  { %v2674_v26 = vpop.f32.mrf.mxu2 }
 0x33f   :  { %v1277_v30 = vmul.f32 %v2674_v26, %v2674_v26  ;;  %v1194_v53 = vsel %vm394_vm1, %v2674_v26, 0.0 }
 0x340   :  { %v1195_v59 = vadd.f32 %v1194_v53, %v1193_v6 }
 0x341   :  { %v1310_v29 = vsel %vm394_vm1, %v1277_v30, 0.0 }
 0x342   :  { %v1311_v19 = vadd.f32 %v1310_v29, %v1309_v25 }
 0x346   :  { %v2676_v13 = vpop.f32.mrf.mxu2 }
 0x347   :  { %v1278_v47 = vmul.f32 %v2676_v13, %v2676_v13  ;;  %v1196_v48 = vsel %vm394_vm1, %v2676_v13, 0.0 }
 0x349   :  { %v1312_v37 = vsel %vm394_vm1, %v1278_v47, 0.0 }
 0x34a   :  { %v1313_v42 = vadd.f32 %v1312_v37, %v1311_v19 }
 0x34b   :  { %1939 = vmatmul.msk.bf16.gmra.mxu2 %vm394_vm1, %v1034_v60  ;;  %v2702_v60 = vpop.f32.mrf.mxu3 }
 0x34c   :  { %v1299_v23 = vmul.f32 %v2702_v60, %v2702_v60  ;;  %v1254_v40 = vsel %vm394_vm1, %v2702_v60, 0.0 }
 0x34e   :  { %v2682_v44 = vpop.f32.mrf.mxu2  ;;  %v1370_v49 = vsel %vm394_vm1, %v1299_v23, 0.0 }
 0x34f   :  { %v1279_v51 = vmul.f32 %v2682_v44, %v2682_v44  ;;  %v1198_v15 = vsel %vm394_vm1, %v2682_v44, 0.0 }
 0x351   :  { %v1314_v32 = vsel %vm394_vm1, %v1279_v51, 0.0 }
 0x352   :  { %v1315_v29 = vadd.f32 %v1314_v32, %v1313_v42 }
 0x353   :  { %v2708_v17 = vpop.f32.mrf.mxu3 }
 0x354   :  { %v1300_v52 = vmul.f32 %v2708_v17, %v2708_v17  ;;  %v1255_v1 = vsel %vm394_vm1, %v2708_v17, 0.0 }
 0x355   :  { %v1256_v45 = vadd.f32 %v1255_v1, %v1254_v40 }
 0x356   :  { %v2684_v22 = vpop.f32.mrf.mxu2  ;;  %v1371_v55 = vsel %vm394_vm1, %v1300_v52, 0.0  ;;  %v1197_v52 = vadd.f32 %v1196_v48, %v1195_v59 }
 0x357   :  { %v1372_v10 = vadd.f32 %v1371_v55, %v1370_v49  ;;  %v1280_v23 = vmul.f32 %v2684_v22, %v2684_v22  ;;  %v1200_v46 = vsel %vm394_vm1, %v2684_v22, 0.0 }
 0x359   :  { %v1316_v25 = vsel %vm394_vm1, %v1280_v23, 0.0 }
 0x35b   :  { %1940 = vmatmul.msk.bf16.gmra.mxu2 %vm394_vm1, %v1035_v56  ;;  %v2712_v56 = vpop.f32.mrf.mxu3 }
 0x35c   :  { %v1301_v5 = vmul.f32 %v2712_v56, %v2712_v56  ;;  %v1257_v18 = vsel %vm394_vm1, %v2712_v56, 0.0 }
 0x35d   :  { %v1258_v57 = vadd.f32 %v1257_v18, %v1256_v45 }
 0x35e   :  { %v2690_v58 = vpop.f32.mrf.mxu2  ;;  %v1373_v34 = vsel %vm394_vm1, %v1301_v5, 0.0  ;;  %v1199_v5 = vadd.f32 %v1198_v15, %v1197_v52 }
 0x35f   :  { %v1374_v62 = vadd.f32 %v1373_v34, %v1372_v10  ;;  %v1281_v59 = vmul.f32 %v2690_v58, %v2690_v58  ;;  %v1202_v42 = vsel %vm394_vm1, %v2690_v58, 0.0 }
 0x360   :  { %v1201_v51 = vadd.f32 %v1200_v46, %v1199_v5 }
 0x361   :  { %v1318_v5 = vsel %vm394_vm1, %v1281_v59, 0.0 }
 0x363   :  { %v2716_v14 = vpop.f32.mrf.mxu3 }
 0x364   :  { %3435 = vst [vmem:[#allocation10_spill] sm:$0xff] %v2716_v14  ;;  %v1302_v38 = vmul.f32 %v2716_v14, %v2716_v14  ;;  %v1259_v50 = vsel %vm394_vm1, %v2716_v14, 0.0 }
 0x365   :  { %v1260_v30 = vadd.f32 %v1259_v50, %v1258_v57 }
 0x366   :  { %v2692_v54 = vpop.f32.mrf.mxu2  ;;  %v1375_v12 = vsel %vm394_vm1, %v1302_v38, 0.0 }
 0x367   :  { %v1376_v55 = vadd.f32 %v1375_v12, %v1374_v62  ;;  %v1317_v62 = vadd.f32 %v1316_v25, %v1315_v29  ;;  %v1203_v29 = vadd.f32 %v1202_v42, %v1201_v51  ;;  %v1282_v51 = vmul.f32 %v2692_v54, %v2692_v54 }
 0x36b   :  { %v2720_v43 = vpop.f32.mrf.mxu3 }
 0x36c   :  { %v1303_v27 = vmul.f32 %v2720_v43, %v2720_v43  ;;  %v1261_v28 = vsel %vm394_vm1, %v2720_v43, 0.0 }
 0x36d   :  { %v1262_v38 = vadd.f32 %v1261_v28, %v1260_v30 }
 0x36e   :  { %v2694_v2 = vpop.f32.mrf.mxu2  ;;  %v1377_v47 = vsel %vm394_vm1, %v1303_v27, 0.0 }
 0x36f   :  { %v1212_v49 = vsel %vm394_vm1, %v2694_v2, 0.0  ;;  %v1283_v18 = vmul.f32 %v2694_v2, %v2694_v2  ;;  %v1378_v37 = vadd.f32 %v1377_v47, %v1376_v55 }
 0x371   :  { %v1328_v30 = vsel %vm394_vm1, %v1283_v18, 0.0  ;;  %v1319_v18 = vadd.f32 %v1318_v5, %v1317_v62 }
 0x373   :  { %v2739_v36 = vpop.f32.mrf.mxu3 }
 0x374   :  { %v1304_v40 = vmul.f32 %v2739_v36, %v2739_v36  ;;  %v1263_v10 = vsel %vm394_vm1, %v2739_v36, 0.0 }
 0x375   :  { %v1264_v52 = vadd.f32 %v1263_v10, %v1262_v38 }
 0x376   :  { %v2696_v24 = vpop.f32.mrf.mxu2  ;;  %v1379_v27 = vsel %vm394_vm1, %v1304_v40, 0.0 }
 0x377   :  { %v1213_v1 = vsel %vm394_vm1, %v2696_v24, 0.0  ;;  %v1284_v6 = vmul.f32 %v2696_v24, %v2696_v24  ;;  %v2823_v55 = vadd.f32 %v1379_v27, %v1378_v37 }
 0x378   :  { %v1214_v45 = vadd.f32 %v1213_v1, %v1212_v49 }
 0x379   :  { %v1329_v57 = vsel %vm394_vm1, %v1284_v6, 0.0 }
 0x37a   :  { %v1330_v47 = vadd.f32 %v1329_v57, %v1328_v30 }
 0x37b   :  { %v2786_v61 = vpop.f32.mrf.mxu3 }
 0x37c   :  { %v1265_v40 = vsel %vm394_vm1, %v2786_v61, 0.0  ;;  %v1305_v38 = vmul.f32 %v2786_v61, %v2786_v61 }
 0x37d   :  { %v1266_v59 = vadd.f32 %v1265_v40, %v1264_v52  ;;  %v1320_v40 = vsel %vm394_vm1, %v1282_v51, 0.0 }
 0x37e   :  { %v2698_v0 = vpop.f32.mrf.mxu2  ;;  %v1381_v52 = vsel %vm394_vm1, %v1305_v38, 0.0 }
 0x37f   :  { %v1215_v53 = vsel %vm394_vm1, %v2698_v0, 0.0  ;;  %v1285_v34 = vmul.f32 %v2698_v0, %v2698_v0 }
 0x380   :  { %v1216_v19 = vadd.f32 %v1215_v53, %v1214_v45 }
 0x381   :  { %v1331_v32 = vsel %vm394_vm1, %v1285_v34, 0.0 }
 0x382   :  { %v1332_v45 = vadd.f32 %v1331_v32, %v1330_v47 }
 0x383   :  { %v2835_v25 = vpop.f32.mrf.mxu3 }
 0x386   :  { %v2700_v4 = vpop.f32.mrf.mxu2 }
 0x387   :  { %v1217_v48 = vsel %vm394_vm1, %v2700_v4, 0.0  ;;  %v1286_v12 = vmul.f32 %v2700_v4, %v2700_v4 }
 0x388   :  { %v1218_v23 = vadd.f32 %v1217_v48, %v1216_v19 }
 0x389   :  { %v1333_v49 = vsel %vm394_vm1, %v1286_v12, 0.0  ;;  %v1204_v12 = vsel %vm394_vm1, %v2692_v54, 0.0 }
 0x38a   :  { %v1334_v19 = vadd.f32 %v1333_v49, %v1332_v45 }
 0x38e   :  { %v2704_v20 = vpop.f32.mrf.mxu2 }
 0x38f   :  { %v1219_v15 = vsel %vm394_vm1, %v2704_v20, 0.0  ;;  %v1287_v28 = vmul.f32 %v2704_v20, %v2704_v20 }
 0x390   :  { %v1220_v46 = vadd.f32 %v1219_v15, %v1218_v23  ;;  %v1267_v15 = vsel %vm394_vm1, %v2835_v25, 0.0 }
 0x391   :  { %v1335_v34 = vsel %vm394_vm1, %v1287_v28, 0.0  ;;  %v1268_v49 = vadd.f32 %v1267_v15, %v1266_v59  ;;  %v1306_v15 = vmul.f32 %v2835_v25, %v2835_v25 }
 0x392   :  { %v1336_v23 = vadd.f32 %v1335_v34, %v1334_v19 }
 0x396   :  { %v2706_v3 = vpop.f32.mrf.mxu2 }
 0x397   :  { %v1221_v1 = vsel %vm394_vm1, %v2706_v3, 0.0  ;;  %v1288_v6 = vmul.f32 %v2706_v3, %v2706_v3 }
 0x398   :  { %v1222_v10 = vadd.f32 %v1221_v1, %v1220_v46  ;;  %v1205_v46 = vadd.f32 %v1204_v12, %v1203_v29 }
 0x399   :  { %v1337_v62 = vsel %vm394_vm1, %v1288_v6, 0.0 }
 0x39a   :  { %v1338_v6 = vadd.f32 %v1337_v62, %v1336_v23  ;;  %v1206_v12 = vrot.slane %v1205_v46, 4 }
 0x39e   :  { %v2710_v41 = vpop.f32.mrf.mxu2 }
 0x39f   :  { %v1223_v53 = vsel %vm394_vm1, %v2710_v41, 0.0  ;;  %v1289_v48 = vmul.f32 %v2710_v41, %v2710_v41 }
 0x3a0   :  { %v1224_v27 = vadd.f32 %v1223_v53, %v1222_v10 }
 0x3a1   :  { %v1339_v28 = vsel %vm394_vm1, %v1289_v48, 0.0 }
 0x3a2   :  { %v1340_v34 = vadd.f32 %v1339_v28, %v1338_v6  ;;  %v1269_v6 = vrot.slane %v1268_v49, 4 }
 0x3a6   :  { %v2714_v21 = vpop.f32.mrf.mxu2 }
 0x3a7   :  { %v1225_v37 = vsel %vm394_vm1, %v2714_v21, 0.0  ;;  %v1290_v32 = vmul.f32 %v2714_v21, %v2714_v21 }
 0x3a8   :  { %v1226_v30 = vadd.f32 %v1225_v37, %v1224_v27 }
 0x3a9   :  { %v1341_v37 = vsel %vm394_vm1, %v1290_v32, 0.0 }
 0x3aa   :  { %v1227_v48 = vrot.slane %v1226_v30, 4  ;;  %v1342_v32 = vadd.f32 %v1341_v37, %v1340_v34  ;;  %v1382_v34 = vadd.f32 %v1381_v52, %v2823_v55  ;;  %v1383_v37 = vsel %vm394_vm1, %v1306_v15, 0.0 }
 0x3ac   :  { %v1228_v9 = vadd.f32 %v1227_v48, %v1226_v30 }
 0x3ae   :  { %v2718_v33 = vpop.f32.mrf.mxu2  ;;  %v1229_v8 = vrot.slane %v1228_v9, 2 }
 0x3af   :  { %v1291_v1 = vmul.f32 %v2718_v33, %v2718_v33  ;;  %v1233_v53 = vsel %vm394_vm1, %v2718_v33, 0.0 }
 0x3b1   :  { %v1349_v51 = vsel %vm394_vm1, %v1291_v1, 0.0 }
 0x3b6   :  { %v2722_v11 = vpop.f32.mrf.mxu2 }
 0x3b7   :  { %v1292_v42 = vmul.f32 %v2722_v11, %v2722_v11  ;;  %v1234_v5 = vsel %vm394_vm1, %v2722_v11, 0.0 }
 0x3b8   :  { %v1235_v29 = vadd.f32 %v1234_v5, %v1233_v53 }
 0x3b9   :  { %v1350_v38 = vsel %vm394_vm1, %v1292_v42, 0.0 }
 0x3ba   :  { %v1351_v62 = vadd.f32 %v1350_v38, %v1349_v51  ;;  %v1343_v51 = vrot.slane %v1342_v32, 4 }
 0x3be   :  { %v2732_v31 = vpop.f32.mrf.mxu2 }
 0x3bf   :  { %v1293_v47 = vmul.f32 %v2732_v31, %v2732_v31  ;;  %v1236_v45 = vsel %vm394_vm1, %v2732_v31, 0.0 }
 0x3c0   :  { %v1237_v42 = vadd.f32 %v1236_v45, %v1235_v29 }
 0x3c1   :  { %v1352_v59 = vsel %vm394_vm1, %v1293_v47, 0.0  ;;  %v1321_v47 = vadd.f32 %v1320_v40, %v1319_v18  ;;  %v1207_v40 = vadd.f32 %v1206_v12, %v1205_v46  ;;  %v1344_v46 = vadd.f32 %v1343_v51, %v1342_v32 }
 0x3c2   :  { %v1353_v53 = vadd.f32 %v1352_v59, %v1351_v62  ;;  %v1270_v62 = vadd.f32 %v1269_v6, %v1268_v49  ;;  %v2906_v49 = vpop.f32.mrf.mxu1  ;;  %v1989_v6 = vld [vmem:[%s3375_s0 + $0x60] sm:$0xff]  ;;  %v1230_v32 = vadd.f32 %v1229_v8, %v1228_v9 }
 0x3c3   :  { %v1322_v48 = vrot.slane %v1321_v47, 4  ;;  %3436 = vst [vmem:[#allocation2_spill] sm:$0xff] %v2906_v49  ;;  %1905 = vmatmul.msk.bf16.gmra.mxu1 %vm157_vm0, %v1989_v6 }
 0x3c6   :  { %v2771_v63 = vpop.f32.mrf.mxu2 }
 0x3c7   :  { %v1294_v10 = vmul.f32 %v2771_v63, %v2771_v63  ;;  %v1238_v19 = vsel %vm394_vm1, %v2771_v63, 0.0 }
 0x3c8   :  { %v1239_v14 = vadd.f32 %v1238_v19, %v1237_v42  ;;  %v1384_v42 = vadd.f32 %v1383_v37, %v1382_v34 }
 0x3c9   :  { %v1354_v28 = vsel %vm394_vm1, %v1294_v10, 0.0 }
 0x3ca   :  { %v1355_v29 = vadd.f32 %v1354_v28, %v1353_v53  ;;  %v2913_v49 = vpop.f32.mrf.mxu1 }
 0x3ce   :  { %v2807_v50 = vpop.f32.mrf.mxu2 }
 0x3cf   :  { %v1295_v27 = vmul.f32 %v2807_v50, %v2807_v50  ;;  %v1240_v1 = vsel %vm394_vm1, %v2807_v50, 0.0 }
 0x3d0   :  { %v1241_v18 = vadd.f32 %v1240_v1, %v1239_v14  ;;  %v1208_v14 = vrot.slane %v1207_v40, 2  ;;  %v1323_v1 = vadd.f32 %v1322_v48, %v1321_v47  ;;  %v1231_v48 = vrot.slane %v1230_v32, 1 }
 0x3d1   :  { %v1356_v38 = vsel %vm394_vm1, %v1295_v27, 0.0 }
 0x3d2   :  { %v1357_v19 = vadd.f32 %v1356_v38, %v1355_v29  ;;  %v1271_v38 = vrot.slane %v1270_v62, 2  ;;  %v1209_v29 = vadd.f32 %v1208_v14, %v1207_v40  ;;  %v1324_v51 = vrot.slane %v1323_v1, 2 }
 0x3d4   :  { %v1325_v8 = vadd.f32 %v1324_v51, %v1323_v1 }
 0x3d6   :  { %v2844_v57 = vpop.f32.mrf.mxu2 }
 0x3d7   :  { %v1296_v5 = vmul.f32 %v2844_v57, %v2844_v57  ;;  %v1242_v45 = vsel %vm394_vm1, %v2844_v57, 0.0 }
 0x3d8   :  { %v1243_v27 = vadd.f32 %v1242_v45, %v1241_v18  ;;  %v1385_v45 = vrot.slane %v1384_v42, 4  ;;  %v1345_v18 = vrot.slane %v1344_v46, 2 }
 0x3d9   :  { %v1358_v59 = vsel %vm394_vm1, %v1296_v5, 0.0 }
 0x3da   :  { %v1359_v55 = vadd.f32 %v1358_v59, %v1357_v19  ;;  %v1272_v59 = vadd.f32 %v1271_v38, %v1270_v62 }
 0x3dc   :  { %v1273_v9 = vrot.slane %v1272_v59, 1 }
 0x3de   :  { %v2880_v23 = vpop.f32.mrf.mxu2 }
 0x3df   :  { %v1297_v10 = vmul.f32 %v2880_v23, %v2880_v23  ;;  %v1244_v30 = vsel %vm394_vm1, %v2880_v23, 0.0 }
 0x3e0   :  { %v1245_v52 = vadd.f32 %v1244_v30, %v1243_v27  ;;  %v1386_v30 = vadd.f32 %v1385_v45, %v1384_v42  ;;  %v1326_v42 = vrot.slane %v1325_v8, 1  ;;  %v1274_v45 = vadd.f32 %v1273_v9, %v1272_v59  ;;  %v1991_v59 = vld [vmem:[%s3377_s7 + $0x18] sm:$0xff] }
 0x3e1   :  { %v1360_v7 = vsel %vm394_vm1, %v1297_v10, 0.0 }
 0x3e2   :  { %v1361_v5 = vadd.f32 %v1360_v7, %v1359_v55  ;;  %v1210_v55 = vrot.slane %v1209_v29, 1 }
 0x3e6   :  { %v2900_v15 = vpop.f32.mrf.mxu2 }
 0x3e7   :  { %v1246_v12 = vsel %vm394_vm1, %v2900_v15, 0.0  ;;  %v1298_v28 = vmul.f32 %v2900_v15, %v2900_v15 }
 0x3e8   :  { %v1247_v53 = vadd.f32 %v1246_v12, %v1245_v52  ;;  %v1346_v52 = vadd.f32 %v1345_v18, %v1344_v46 }
 0x3e9   :  { %v1362_v10 = vsel %vm394_vm1, %v1298_v28, 0.0  ;;  %v1387_v28 = vrot.slane %v1386_v30, 2 }
 0x3ea   :  { %v1248_v34 = vrot.slane %v1247_v53, 4  ;;  %v1363_v37 = vadd.f32 %v1362_v10, %v1361_v5  ;;  %v1232_v5 = vadd.f32 %v1231_v48, %v1230_v32  ;;  %v1347_v10 = vrot.slane %v1346_v52, 1  ;;  %v2919_v32 = vpop.f32.mrf.mxu1 }
 0x3eb   :  { %v1388_v38 = vadd.f32 %v1387_v28, %v1386_v30 }
 0x3ec   :  { %v1249_v47 = vadd.f32 %v1248_v34, %v1247_v53  ;;  %v1364_v7 = vrot.slane %v1363_v37, 4  ;;  %v1211_v53 = vadd.f32 %v1210_v55, %v1209_v29  ;;  %v1348_v18 = vadd.f32 %v1347_v10, %v1346_v52  ;;  %v1990_v29 = vld [vmem:[%s3375_s0 + $0x68] sm:$0xff] }
 0x3ed   :  { %1906 = vmatmul.msk.bf16.gmra.mxu1 %vm157_vm0, %v1990_v29  ;;  %v1389_v51 = vrot.slane %v1388_v38, 1  ;;  %v1993_v52 = vld [vmem:[%s3377_s7 + $0x8] sm:$0xff] }
 0x3ee   :  { %v1250_v19 = vrot.slane %v1249_v47, 2  ;;  %v1365_v27 = vadd.f32 %v1364_v7, %v1363_v37  ;;  %v1395_v37 = vsel %vm599_vm2, %v1232_v5, %v1211_v53  ;;  %v1327_v7 = vadd.f32 %v1326_v42, %v1325_v8 }
 0x3f0   :  { %v1251_v12 = vadd.f32 %v1250_v19, %v1249_v47  ;;  %v1366_v6 = vrot.slane %v1365_v27, 2  ;;  %v1424_v30 = vsel %vm599_vm2, %v1348_v18, %v1327_v7  ;;  %v1390_v19 = vadd.f32 %v1389_v51, %v1388_v38 }
 0x3f2   :  { %v1252_v40 = vrot.slane %v1251_v12, 1  ;;  %v1367_v14 = vadd.f32 %v1366_v6, %v1365_v27  ;;  %v1992_v27 = vld [vmem:[%s3377_s7 + $0x10] sm:$0xff]  ;;  %v2949_v6 = vpop.f32.mrf.mxu1 }
 0x3f4   :  { %v1253_v34 = vadd.f32 %v1252_v40, %v1251_v12  ;;  %v1368_v62 = vrot.slane %v1367_v14, 1  ;;  %v1994_v12 = vld [vmem:[%s3377_s7] sm:$0xff] }
 0x3f6   :  { %v1396_v46 = vsel %vm601_vm3, %v1253_v34, %v1395_v37  ;;  %v1369_v1 = vadd.f32 %v1368_v62, %v1367_v14 }
 0x3f7   :  { %v1397_v47 = vsel %vm603_vm4, %v1274_v45, %v1396_v46 }
 0x3f8   :  { %1945 = vmatmul.msk.f32.vlgmr.msrb.gmra.mxu3 %vm394_vm1, %v1397_v47  ;;  %v1425_v48 = vsel %vm601_vm3, %v1369_v1, %v1424_v30 }
 0x3f9   :  { %1947 = vmatpush.xpose.msk.msrb.mxu3 %vm672_vm5, %v1991_v59  ;;  %v1426_v55 = vsel %vm603_vm4, %v1390_v19, %v1425_v48 }
 0x3fa   :  { %v2952_v5 = vpop.f32.mrf.mxu1 }
 0x3fd   :  { %1948 = vmatpush.xpose.msk.msrb.mxu3 %vm672_vm5, %v1992_v27 }
 0x400   :  { %1946 = vmatmul.msk.f32.vlgmr.msra.gmra.mxu3 %vm394_vm1, %v1426_v55 }
 0x401   :  { %1949 = vmatpush.xpose.msk.msrb.mxu3 %vm672_vm5, %v1993_v52 }
 0x402   :  { %v2954_v62 = vpop.f32.mrf.mxu1 }
 0x405   :  { %1950 = vmatpush.xpose.msk.msrb.mxu3 %vm672_vm5, %v1994_v12 }
 0x409   :  { %1952 = vmatpush.xpose.msk.msra.mxu3 %vm672_vm5, %v1991_v59 }
 0x40a   :  { %v2956_v46 = vpop.f32.mrf.mxu1 }
 0x40d   :  { %1953 = vmatpush.xpose.msk.msra.mxu3 %vm672_vm5, %v1992_v27 }
 0x411   :  { %1954 = vmatpush.xpose.msk.msra.mxu3 %vm672_vm5, %v1993_v52 }
 0x412   :  { %v2959_v29 = vpop.f32.mrf.mxu1 }
 0x415   :  { %1955 = vmatpush.xpose.msk.msra.mxu3 %vm672_vm5, %v1994_v12 }
 0x41a   :  { %v2961_v7 = vpop.f32.mrf.mxu1 }
 0x422   :  { %v2963_v51 = vpop.f32.mrf.mxu1 }
 0x423   :  { %3437 = vst [vmem:[#allocation3_spill] sm:$0xff] %v2963_v51 }
 0x42a   :  { %v2965_v59 = vpop.f32.mrf.mxu1 }
 0x42b   :  { %3438 = vst [vmem:[#allocation11_spill] sm:$0xff] %v2965_v59 }
 0x432   :  { %v2967_v30 = vpop.f32.mrf.mxu1 }
 0x433   :  { %3439 = vst [vmem:[#allocation12_spill] sm:$0xff] %v2967_v30 }
 0x43a   :  { %v2969_v48 = vpop.f32.mrf.mxu1 }
 0x43b   :  { %3440 = vst [vmem:[#allocation13_spill] sm:$0xff] %v2969_v48 }
 0x442   :  { %v2971_v19 = vpop.f32.mrf.mxu1 }
 0x443   :  { %3441 = vst [vmem:[#allocation14_spill] sm:$0xff] %v2971_v19 }
 0x44a   :  { %v2973_v27 = vpop.f32.mrf.mxu1 }
 0x44b   :  { %3442 = vst [vmem:[#allocation15_spill] sm:$0xff] %v2973_v27 }
 0x452   :  { %v2975_v55 = vpop.f32.mrf.mxu1 }
 0x453   :  { %3443 = vst [vmem:[#allocation16_spill] sm:$0xff] %v2975_v55 }
 0x45a   :  { %v2977_v52 = vpop.f32.mrf.mxu1 }
 0x45b   :  { %3444 = vst [vmem:[#allocation4_spill] sm:$0xff] %v2977_v52 }
 0x462   :  { %v2979_v12 = vpop.f32.mrf.mxu1 }
 0x463   :  { %3445 = vst [vmem:[#allocation5_spill] sm:$0xff] %v2979_v12 }
 0x47b   :  { %v1417_v8 = vpop.f32.mrf.mxu3 }
 0x47c   :  { %v1449_v9 = vmul.f32 0.00390625, %v1417_v8  ;;  %v2981_v8 = vpop.f32.mrf.mxu1 }
 0x47d   :  { %3446 = vst [vmem:[#allocation6_spill] sm:$0xff] %v2981_v8 }
 0x47e   :  { %1951 = vmatmul.msk.f32.vlgmr.msrb.gmra.mxu3 %vm672_vm5, %v1449_v9  ;;  %v1451_v40 = vmul.f32 %v1449_v9, %v1449_v9 }
 0x483   :  { %v1446_v28 = vpop.f32.mrf.mxu3 }
 0x484   :  { %v1450_v14 = vmul.f32 0.00390625, %v1446_v28  ;;  %v2983_v9 = vpop.f32.mrf.mxu1 }
 0x485   :  { %3447 = vst [vmem:[#allocation7_spill] sm:$0xff] %v2983_v9 }
 0x486   :  { %v1452_v53 = vsub.f32 %v1450_v14, %v1451_v40 }
 0x488   :  { %v1453_v10 = vmax.f32 %v1452_v53, 0.0  ;;  %v1983_v53 = vld [vmem:[%s3381_s5] ss:$0 sm:$0xff] }
 0x48a   :  { %v1454_v34 = vadd.f32 1e-05, %v1453_v10 }
 0x48c   :  { %1987 = vrsqrt.f32 %v1454_v34  ;;  %vm1461_vm1 = vweird.f32 %v1454_v34  ;;  %v2985_v28 = vpop.f32.mrf.mxu1 }
 0x48d   :  { %3448 = vst [vmem:[#allocation8_spill] sm:$0xff] %v2985_v28 }
 0x492   :  { %v1988_v42 = vpop.eup %1987 }
 0x493   :  { %v1456_v38 = vmul.f32 %v1988_v42, %v1454_v34  ;;  %vm1462_vm0 = vweird.f32 %v1988_v42 }
 0x494   :  { %vm1463_vm2 = vmor %vm1461_vm1, %vm1462_vm0  ;;  %v2987_v14 = vpop.f32.mrf.mxu1  ;;  %vm1768_vm0 = vcmask 257024  }
 0x495   :  { %v1457_v45 = vmul.f32 %v1988_v42, %v1456_v38  ;;  %3449 = vst [vmem:[#allocation9_spill] sm:$0xff] %v2987_v14 }
 0x497   :  { %v1458_v37 = vmul.f32 0.5, %v1457_v45 }
 0x499   :  { %v1459_v18 = vsub.f32 1.5, %v1458_v37  ;;  %v1984_v37 = vld [vmem:[%s3382_s6] ss:$0 sm:$0xff] }
 0x49b   :  { %v1460_v47 = vmul.f32 %v1988_v42, %v1459_v18 }
 0x49d   :  { %v1464_v1 = vsel %vm1463_vm2, %v1988_v42, %v1460_v47  ;;  %v2992_v42 = vpop.f32.mrf.mxu1 }
 0x49e   :  { %1956 = vmatmul.msk.f32.vlgmr.msra.gmra.mxu3 %vm672_vm5, %v1464_v1  ;;  %3450 = vst [vmem:[#allocation21_spill] sm:$0xff] %v2992_v42 }
 0x501   :  { %v1485_v40 = vpop.f32.mrf.mxu3 }
 0x521   :  { %v1508_v10 = vpop.f32.mrf.mxu3 }
 0x522   :  { %v1514_v34 = vmul.f32 %v1983_v53, %v1508_v10 }
 0x524   :  { %v1521_v38 = vrot.slane %v1514_v34, 1  ;;  %v1515_v45 = vmul.f32 %v1514_v34, %v1485_v40  ;;  %v1522_v18 = vrot.slane %v1514_v34, 2  ;;  %v1523_v47 = vrot.slane %v1514_v34, 3 }
 0x525   :  { %v1524_v1 = vperm.slane %v1514_v34, 0 }
 0x526   :  { %v1525_v28 = vperm.slane %v1521_v38, 0  ;;  %v1519_v9 = vsub.f32 %v1984_v37, %v1515_v45  ;;  %v1526_v14 = vperm.slane %v1522_v18, 0  ;;  %v2997_v8 = vperm.slane %v1523_v47, 0  ;;  %v3011_v37 = vpop.f32.mrf.mxu1 }
 0x527   :  { %v1532_v12 = vmul.f32 %v1524_v1, %v2666_v39  ;;  %v1533_v53 = vmul.f32 %v1524_v1, %v2668_v16  ;;  %v1534_v10 = vmul.f32 %v1524_v1, %v2674_v26  ;;  %v1535_v40 = vmul.f32 %v1524_v1, %v2676_v13  ;;  %3452 = vst [vmem:[#allocation23_spill] sm:$0xff] %v3011_v37 }
 0x528   :  { %3451 = vst [vmem:[#allocation22_spill] sm:$0xff] %v2997_v8  ;;  %v1536_v42 = vmul.f32 %v1524_v1, %v2682_v44  ;;  %v1537_v52 = vmul.f32 %v1524_v1, %v2684_v22  ;;  %v1538_v55 = vmul.f32 %v1524_v1, %v2690_v58  ;;  %v1539_v34 = vmul.f32 %v1524_v1, %v2692_v54 }
 0x529   :  { %v1540_v38 = vmul.f32 %v1525_v28, %v2694_v2  ;;  %v1541_v45 = vmul.f32 %v1525_v28, %v2696_v24  ;;  %v1542_v39 = vmul.f32 %v1525_v28, %v2698_v0  ;;  %v1543_v16 = vmul.f32 %v1525_v28, %v2700_v4 }
 0x52a   :  { %v1544_v26 = vmul.f32 %v1525_v28, %v2704_v20  ;;  %v1545_v13 = vmul.f32 %v1525_v28, %v2706_v3  ;;  %v1546_v44 = vmul.f32 %v1525_v28, %v2710_v41  ;;  %v1565_v22 = vrot.slane %v1519_v9, 1 }
 0x52b   :  { %v1547_v58 = vmul.f32 %v1525_v28, %v2714_v21  ;;  %v1548_v54 = vmul.f32 %v1526_v14, %v2718_v33  ;;  %v1549_v2 = vmul.f32 %v1526_v14, %v2722_v11  ;;  %v1550_v24 = vmul.f32 %v1526_v14, %v2732_v31 }
 0x52c   :  { %v1551_v0 = vmul.f32 %v1526_v14, %v2771_v63  ;;  %v1566_v4 = vrot.slane %v1519_v9, 2  ;;  %v1567_v18 = vrot.slane %v1519_v9, 3  ;;  %v1568_v47 = vperm.slane %v1519_v9, 0 }
 0x52d   :  { %v1552_v20 = vmul.f32 %v1526_v14, %v2807_v50  ;;  %v1553_v3 = vmul.f32 %v1526_v14, %v2844_v57  ;;  %v1554_v41 = vmul.f32 %v1526_v14, %v2880_v23  ;;  %v1555_v1 = vmul.f32 %v1526_v14, %v2900_v15 }
 0x52e   :  { %v1556_v21 = vmul.f32 %v2997_v8, %v2702_v60  ;;  %v1557_v33 = vmul.f32 %v2997_v8, %v2708_v17  ;;  %v1558_v11 = vmul.f32 %v2997_v8, %v2712_v56  ;;  %v1569_v31 = vperm.slane %v1565_v22, 0  ;;  %v374_v59 = vpop.f32.mrf.mxu1 }
 0x52f   :  { %v1560_v63 = vmul.f32 %v2997_v8, %v2720_v43  ;;  %v1561_v50 = vmul.f32 %v2997_v8, %v2739_v36  ;;  %v1562_v57 = vmul.f32 %v2997_v8, %v2786_v61  ;;  %v1563_v23 = vmul.f32 %v2997_v8, %v2835_v25 }
 0x530   :  { %v1570_v60 = vperm.slane %v1566_v4, 0  ;;  %v3039_v15 = vperm.slane %v1567_v18, 0  ;;  %v1576_v17 = vadd.f32 %v1568_v47, %v1532_v12  ;;  %v1577_v9 = vadd.f32 %v1568_v47, %v1533_v53 }
 0x531   :  { %v1578_v28 = vadd.f32 %v1568_v47, %v1534_v10  ;;  %v1579_v56 = vadd.f32 %v1568_v47, %v1535_v40  ;;  %v1580_v14 = vadd.f32 %v1568_v47, %v1536_v42  ;;  %v1581_v22 = vadd.f32 %v1568_v47, %v1537_v52 }
 0x532   :  { %v1582_v37 = vadd.f32 %v1568_v47, %v1538_v55  ;;  %v1583_v43 = vadd.f32 %v1568_v47, %v1539_v34  ;;  %v1584_v27 = vadd.f32 %v1569_v31, %v1540_v38  ;;  %v1585_v19 = vadd.f32 %v1569_v31, %v1541_v45 }
 0x533   :  { %v1586_v36 = vadd.f32 %v1569_v31, %v1542_v39  ;;  %v1587_v48 = vadd.f32 %v1569_v31, %v1543_v16  ;;  %v1588_v30 = vadd.f32 %v1569_v31, %v1544_v26  ;;  %v1589_v61 = vadd.f32 %v1569_v31, %v1545_v13  ;;  %v3453_v13 = vld [vmem:[#allocation2_spill] sm:$0xff] }
 0x534   :  { %v1590_v51 = vadd.f32 %v1569_v31, %v1546_v44  ;;  %v1591_v25 = vadd.f32 %v1569_v31, %v1547_v58  ;;  %v1592_v4 = vadd.f32 %v1570_v60, %v1548_v54  ;;  %v1593_v18 = vadd.f32 %v1570_v60, %v1549_v2 }
 0x535   :  { %v1594_v8 = vadd.f32 %v1570_v60, %v1550_v24  ;;  %v1595_v12 = vadd.f32 %v1570_v60, %v1551_v0  ;;  %v1596_v53 = vadd.f32 %v1570_v60, %v1552_v20  ;;  %v1597_v10 = vadd.f32 %v1570_v60, %v1553_v3  ;;  %v3454_v3 = vld [vmem:[#allocation3_spill] sm:$0xff] }
 0x536   :  { %v1598_v40 = vadd.f32 %v1570_v60, %v1554_v41  ;;  %v1599_v42 = vadd.f32 %v1570_v60, %v1555_v1  ;;  %v1600_v55 = vadd.f32 %v3039_v15, %v1556_v21  ;;  %v1601_v52 = vadd.f32 %v3039_v15, %v1557_v33  ;;  %v3461_v21 = vld [vmem:[#allocation4_spill] sm:$0xff] }
 0x537   :  { %v1602_v34 = vadd.f32 %v3039_v15, %v1558_v11  ;;  %v1604_v38 = vadd.f32 %v3039_v15, %v1560_v63  ;;  %v1605_v45 = vadd.f32 %v3039_v15, %v1561_v50  ;;  %v1606_v39 = vadd.f32 %v3039_v15, %v1562_v57  ;;  %v3464_v63 = vld [vmem:[#allocation7_spill] sm:$0xff] }
 0x538   :  { %v1607_v16 = vadd.f32 %v3039_v15, %v1563_v23  ;;  %v1608_v26 = vadd.f32 %v1576_v17, %v2887_v35  ;;  %v1609_v44 = vadd.f32 %v1577_v9, %v3453_v13  ;;  %v1610_v58 = vadd.f32 %v1578_v28, %v2913_v49  ;;  %v3455_v49 = vld [vmem:[#allocation11_spill] sm:$0xff]  ;;  %v3466_v23 = vld [vmem:[#allocation9_spill] sm:$0xff]  ;;  %v377_v17 = vpop.f32.mrf.mxu1 }
 0x539   :  { %v1611_v54 = vadd.f32 %v1579_v56, %v2919_v32  ;;  %v1612_v2 = vadd.f32 %v1580_v14, %v2949_v6  ;;  %v1613_v24 = vadd.f32 %v1581_v22, %v2952_v5  ;;  %v1614_v0 = vadd.f32 %v1582_v37, %v2954_v62  ;;  %v3456_v6 = vld [vmem:[#allocation12_spill] sm:$0xff]  ;;  %v3457_v5 = vld [vmem:[#allocation13_spill] sm:$0xff]  ;;  %v3468_v56 = vld [vmem:[#allocation23_spill] sm:$0xff] }
 0x53a   :  { %v3056_v47 = vadd.f32 %v1583_v43, %v2956_v46  ;;  %v3059_v20 = vadd.f32 %v1584_v27, %v2959_v29  ;;  %v3062_v35 = vadd.f32 %v1585_v19, %v2961_v7  ;;  %v3065_v41 = vadd.f32 %v1586_v36, %v3454_v3  ;;  %v3458_v46 = vld [vmem:[#allocation14_spill] sm:$0xff]  ;;  %v3459_v29 = vld [vmem:[#allocation15_spill] sm:$0xff]  ;;  %v3460_v7 = vld [vmem:[#allocation16_spill] sm:$0xff] }
 0x53b   :  { %v3068_v32 = vadd.f32 %v1587_v48, %v3455_v49  ;;  %v3071_v1 = vadd.f32 %v1588_v30, %v3456_v6  ;;  %v3074_v62 = vadd.f32 %v1589_v61, %v3457_v5  ;;  %v3077_v37 = vadd.f32 %v1590_v51, %v3458_v46  ;;  %v3462_v48 = vld [vmem:[#allocation5_spill] sm:$0xff]  ;;  %v3463_v30 = vld [vmem:[#allocation6_spill] sm:$0xff]  ;;  %v3465_v51 = vld [vmem:[#allocation8_spill] sm:$0xff] }
 0x53c   :  { %v3080_v27 = vadd.f32 %v1591_v25, %v3459_v29  ;;  %v3083_v19 = vadd.f32 %v1592_v4, %v3460_v7  ;;  %v3086_v33 = vadd.f32 %v1593_v18, %v3461_v21  ;;  %v3089_v11 = vadd.f32 %v1594_v8, %v3462_v48  ;;  %v3467_v9 = vld [vmem:[#allocation21_spill] sm:$0xff]  ;;  %v3470_v4 = vld [vmem:[#allocation18_spill] sm:$0xff] }
 0x53d   :  { %v3092_v31 = vadd.f32 %v1595_v12, %v3463_v30  ;;  %v3095_v50 = vadd.f32 %v1596_v53, %v3464_v63  ;;  %v3098_v57 = vadd.f32 %v1597_v10, %v3465_v51  ;;  %v3101_v60 = vadd.f32 %v1598_v40, %v3466_v23  ;;  %v3469_v36 = vld [vmem:[#allocation17_spill] sm:$0xff]  ;;  %v3471_v12 = vld [vmem:[#allocation19_spill] sm:$0xff]  ;;  %v3472_v40 = vld [vmem:[#allocation20_spill] sm:$0xff] }
 0x53e   :  { %v3104_v28 = vadd.f32 %v1599_v42, %v3467_v9  ;;  %v3107_v14 = vadd.f32 %v1600_v55, %v3468_v56  ;;  %v3109_v8 = vadd.f32 %v1601_v52, %v374_v59  ;;  %v1672_v22 = vmul.f32 0.2, %v1608_v26 }
 0x53f   :  { %v3111_v43 = vadd.f32 %v1602_v34, %v377_v17  ;;  %v3114_v61 = vadd.f32 %v1604_v38, %v3469_v36  ;;  %vm1640_vm3 = vcmp.gt.f32.partialorder %v1608_v26, 0.0  ;;  %v1673_v25 = vmul.f32 0.2, %v1609_v44 }
 0x540   :  { %v3117_v18 = vadd.f32 %v1605_v45, %v3470_v4  ;;  %v3120_v53 = vadd.f32 %v1606_v39, %v3471_v12  ;;  %vm1641_vm4 = vcmp.gt.f32.partialorder %v1609_v44, 0.0  ;;  %v1674_v10 = vmul.f32 0.2, %v1610_v58 }
 0x541   :  { %v3123_v42 = vadd.f32 %v1607_v16, %v3472_v40  ;;  %vm1642_vm5 = vcmp.gt.f32.partialorder %v1610_v58, 0.0  ;;  %vm1643_vm11 = vcmp.gt.f32.partialorder %v1611_v54, 0.0  ;;  %v1675_v59 = vmul.f32 0.2, %v1611_v54 }
 0x542   :  { %vm1644_vm12 = vcmp.gt.f32.partialorder %v1612_v2, 0.0  ;;  %vm1645_vm13 = vcmp.gt.f32.partialorder %v1613_v24, 0.0  ;;  %v1676_v55 = vmul.f32 0.2, %v1612_v2  ;;  %v1704_v52 = vsel %vm1640_vm3, %v1608_v26, %v1672_v22 }
 0x543   :  { %vm1646_vm14 = vcmp.gt.f32.partialorder %v1614_v0, 0.0  ;;  %vm1647_vm15 = vcmp.gt.f32.partialorder %v3056_v47, 0.0  ;;  %v1677_v34 = vmul.f32 0.2, %v1613_v24  ;;  %v1705_v38 = vsel %vm1641_vm4, %v1609_v44, %v1673_v25 }
 0x544   :  { %vm1648_vm6 = vcmp.gt.f32.partialorder %v3059_v20, 0.0  ;;  %vm1649_vm7 = vcmp.gt.f32.partialorder %v3062_v35, 0.0  ;;  %v1678_v45 = vmul.f32 0.2, %v1614_v0  ;;  %v1706_v39 = vsel %vm1642_vm5, %v1610_v58, %v1674_v10 }
 0x545   :  { %vm1650_vm8 = vcmp.gt.f32.partialorder %v3065_v41, 0.0  ;;  %v1679_v16 = vmul.f32 0.2, %v3056_v47  ;;  %v1707_v13 = vsel %vm1643_vm11, %v1611_v54, %v1675_v59  ;;  %v1736_v3 = vpack.c.bf16 %v1704_v52, %v1704_v52 }
 0x546   :  { %vm1651_vm9 = vcmp.gt.f32.partialorder %v3068_v32, 0.0  ;;  %v1680_v26 = vmul.f32 0.2, %v3059_v20  ;;  %v1708_v49 = vsel %vm1644_vm12, %v1612_v2, %v1676_v55  ;;  %v1737_v44 = vpack.c.bf16 %v1705_v38, %v1705_v38  ;;  %v3473_v38 = vld [vmem:[#allocation10_spill] sm:$0xff] }
 0x547   :  { %vm1652_vm10 = vcmp.gt.f32.partialorder %v3071_v1, 0.0  ;;  %v1681_v6 = vmul.f32 0.2, %v3062_v35  ;;  %v1709_v58 = vsel %vm1645_vm13, %v1613_v24, %v1677_v34  ;;  %v1738_v5 = vpack.c.bf16 %v1706_v39, %v1706_v39  ;;  %1769 = vst.msk [vmem:[%s3383_s9] sm:$0xf] %vm1768_vm0, %v1736_v3 }
 0x548   :  { %v1682_v46 = vmul.f32 0.2, %v3065_v41  ;;  %v1710_v29 = vsel %vm1646_vm14, %v1614_v0, %v1678_v45  ;;  %v1739_v54 = vpack.c.bf16 %v1707_v13, %v1707_v13  ;;  %vm1653_vm1 = vcmp.gt.f32.partialorder %v3074_v62, 0.0  ;;  %1770 = vst.msk [vmem:[%s3383_s9 + $0x4] sm:$0xf] %vm1768_vm0, %v1737_v44 }
 0x549   :  { %v1683_v7 = vmul.f32 0.2, %v3068_v32  ;;  %v1711_v2 = vsel %vm1647_vm15, %v3056_v47, %v1679_v16  ;;  %v1740_v21 = vpack.c.bf16 %v1708_v49, %v1708_v49  ;;  %vm1654_vm2 = vcmp.gt.f32.partialorder %v3077_v37, 0.0  ;;  %1771 = vst.msk [vmem:[%s3383_s9 + $0x8] sm:$0xf] %vm1768_vm0, %v1738_v5 }
 0x54a   :  { %v1684_v24 = vmul.f32 0.2, %v3071_v1  ;;  %v1712_v0 = vsel %vm1648_vm6, %v3059_v20, %v1680_v26  ;;  %v1741_v48 = vpack.c.bf16 %v1709_v58, %v1709_v58  ;;  %vm1655_vm3 = vcmp.gt.f32.partialorder %v3080_v27, 0.0  ;;  %1772 = vst.msk [vmem:[%s3383_s9 + $0xc] sm:$0xf] %vm1768_vm0, %v1739_v54 }
 0x54b   :  { %v1685_v47 = vmul.f32 0.2, %v3074_v62  ;;  %v1713_v30 = vsel %vm1649_vm7, %v3062_v35, %v1681_v6  ;;  %v1742_v63 = vpack.c.bf16 %v1710_v29, %v1710_v29  ;;  %vm1656_vm4 = vcmp.gt.f32.partialorder %v3083_v19, 0.0  ;;  %1773 = vst.msk [vmem:[%s3383_s9 + $0x10] sm:$0xf] %vm1768_vm0, %v1740_v21 }
 0x54c   :  { %v1686_v20 = vmul.f32 0.2, %v3077_v37  ;;  %v1714_v51 = vsel %vm1650_vm8, %v3065_v41, %v1682_v46  ;;  %v1743_v23 = vpack.c.bf16 %v1711_v2, %v1711_v2  ;;  %vm1657_vm5 = vcmp.gt.f32.partialorder %v3086_v33, 0.0  ;;  %1774 = vst.msk [vmem:[%s3383_s9 + $0x14] sm:$0xf] %vm1768_vm0, %v1741_v48 }
 0x54d   :  { %v1687_v35 = vmul.f32 0.2, %v3080_v27  ;;  %v1715_v17 = vsel %vm1651_vm9, %v3068_v32, %v1683_v7  ;;  %v1744_v9 = vpack.c.bf16 %v1712_v0, %v1712_v0  ;;  %vm1658_vm11 = vcmp.gt.f32.partialorder %v3089_v11, 0.0  ;;  %1775 = vst.msk [vmem:[%s3383_s9 + $0x18] sm:$0xf] %vm1768_vm0, %v1742_v63 }
 0x54e   :  { %v1688_v41 = vmul.f32 0.2, %v3083_v19  ;;  %v1716_v56 = vsel %vm1652_vm10, %v3071_v1, %v1684_v24  ;;  %v1745_v22 = vpack.c.bf16 %v1713_v30, %v1713_v30  ;;  %vm1659_vm12 = vcmp.gt.f32.partialorder %v3092_v31, 0.0  ;;  %1776 = vst.msk [vmem:[%s3383_s9 + $0x1c] sm:$0xf] %vm1768_vm0, %v1743_v23 }
 0x54f   :  { %v1689_v32 = vmul.f32 0.2, %v3086_v33  ;;  %v1717_v36 = vsel %vm1653_vm1, %v3074_v62, %v1685_v47  ;;  %v1746_v25 = vpack.c.bf16 %v1714_v51, %v1714_v51  ;;  %vm1660_vm13 = vcmp.gt.f32.partialorder %v3095_v50, 0.0  ;;  %1777 = vst.msk [vmem:[%s3383_s9 + $0x20] sm:$0xf] %vm1768_vm0, %v1744_v9 }
 0x550   :  { %v1690_v1 = vmul.f32 0.2, %v3089_v11  ;;  %v1718_v4 = vsel %vm1654_vm2, %v3077_v37, %v1686_v20  ;;  %v1747_v12 = vpack.c.bf16 %v1715_v17, %v1715_v17  ;;  %vm1661_vm14 = vcmp.gt.f32.partialorder %v3098_v57, 0.0  ;;  %1778 = vst.msk [vmem:[%s3383_s9 + $0x24] sm:$0xf] %vm1768_vm0, %v1745_v22 }
 0x551   :  { %v1691_v62 = vmul.f32 0.2, %v3092_v31  ;;  %v1719_v10 = vsel %vm1655_vm3, %v3080_v27, %v1687_v35  ;;  %v1748_v40 = vpack.c.bf16 %v1716_v56, %v1716_v56  ;;  %vm1662_vm15 = vcmp.gt.f32.partialorder %v3101_v60, 0.0  ;;  %1779 = vst.msk [vmem:[%s3383_s9 + $0x28] sm:$0xf] %vm1768_vm0, %v1746_v25 }
 0x552   :  { %v1692_v37 = vmul.f32 0.2, %v3095_v50  ;;  %v1720_v59 = vsel %vm1656_vm4, %v3083_v19, %v1688_v41  ;;  %v1749_v55 = vpack.c.bf16 %v1717_v36, %v1717_v36  ;;  %v1693_v27 = vmul.f32 0.2, %v3098_v57  ;;  %v3474_v19 = vld [vmem:[#allocation22_spill] sm:$0xff] }
 0x553   :  { %v1721_v52 = vsel %vm1657_vm5, %v3086_v33, %v1689_v32  ;;  %v1750_v34 = vpack.c.bf16 %v1718_v4, %v1718_v4  ;;  %v1559_v45 = vmul.f32 %v3474_v19, %v3473_v38  ;;  %vm1663_vm6 = vcmp.gt.f32.partialorder %v3104_v28, 0.0  ;;  %1780 = vst.msk [vmem:[%s3383_s9 + $0x2c] sm:$0xf] %vm1768_vm0, %v1747_v12 }
 0x554   :  { %v1694_v39 = vmul.f32 0.2, %v3101_v60  ;;  %v1722_v16 = vsel %vm1658_vm11, %v3089_v11, %v1690_v1  ;;  %v1751_v13 = vpack.c.bf16 %v1719_v10, %v1719_v10  ;;  %v1695_v33 = vmul.f32 0.2, %v3104_v28  ;;  %1781 = vst.msk [vmem:[%s3383_s9 + $0x30] sm:$0xf] %vm1768_vm0, %v1748_v40 }
 0x555   :  { %v1723_v3 = vsel %vm1659_vm12, %v3092_v31, %v1691_v62  ;;  %v1752_v26 = vpack.c.bf16 %v1720_v59, %v1720_v59  ;;  %v1603_v11 = vadd.f32 %v3039_v15, %v1559_v45  ;;  %vm1664_vm7 = vcmp.gt.f32.partialorder %v3107_v14, 0.0  ;;  %1782 = vst.msk [vmem:[%s3383_s9 + $0x34] sm:$0xf] %vm1768_vm0, %v1749_v55 }
 0x556   :  { %v1696_v49 = vmul.f32 0.2, %v3107_v14  ;;  %v1724_v44 = vsel %vm1660_vm13, %v3095_v50, %v1692_v37  ;;  %v1753_v6 = vpack.c.bf16 %v1721_v52, %v1721_v52  ;;  %vm1665_vm8 = vcmp.gt.f32.partialorder %v3109_v8, 0.0  ;;  %1783 = vst.msk [vmem:[%s3383_s9 + $0x38] sm:$0xf] %vm1768_vm0, %v1750_v34 }
 0x557   :  { %v1697_v31 = vmul.f32 0.2, %v3109_v8  ;;  %v1725_v15 = vsel %vm1661_vm14, %v3098_v57, %v1693_v27  ;;  %v1754_v58 = vpack.c.bf16 %v1722_v16, %v1722_v16  ;;  %vm1666_vm9 = vcmp.gt.f32.partialorder %v3111_v43, 0.0  ;;  %1784 = vst.msk [vmem:[%s3383_s9 + $0x3c] sm:$0xf] %vm1768_vm0, %v1751_v13  ;;  %v379_v57 = vpop.f32.mrf.mxu1 }
 0x558   :  { %v1698_v50 = vmul.f32 0.2, %v3111_v43  ;;  %v1726_v5 = vsel %vm1662_vm15, %v3101_v60, %v1694_v39  ;;  %v1755_v46 = vpack.c.bf16 %v1723_v3, %v1723_v3  ;;  %v1700_v29 = vmul.f32 0.2, %v3114_v61  ;;  %1785 = vst.msk [vmem:[%s3383_s9 + $0x40] sm:$0xf] %vm1768_vm0, %v1752_v26 }
 0x559   :  { %v1727_v54 = vsel %vm1663_vm6, %v3104_v28, %v1695_v33  ;;  %v1756_v7 = vpack.c.bf16 %v1724_v44, %v1724_v44  ;;  %v1635_v60 = vadd.f32 %v1603_v11, %v379_v57  ;;  %vm1668_vm10 = vcmp.gt.f32.partialorder %v3114_v61, 0.0  ;;  %1786 = vst.msk [vmem:[%s3383_s9 + $0x44] sm:$0xf] %vm1768_vm0, %v1753_v6 }
 0x55a   :  { %v1701_v2 = vmul.f32 0.2, %v3117_v18  ;;  %v1728_v21 = vsel %vm1664_vm7, %v3107_v14, %v1696_v49  ;;  %v1757_v24 = vpack.c.bf16 %v1725_v15, %v1725_v15  ;;  %vm1669_vm1 = vcmp.gt.f32.partialorder %v3117_v18, 0.0  ;;  %1787 = vst.msk [vmem:[%s3383_s9 + $0x48] sm:$0xf] %vm1768_vm0, %v1754_v58 }
 0x55b   :  { %v1702_v28 = vmul.f32 0.2, %v3120_v53  ;;  %v1729_v0 = vsel %vm1665_vm8, %v3109_v8, %v1697_v31  ;;  %v1758_v48 = vpack.c.bf16 %v1726_v5, %v1726_v5  ;;  %vm1670_vm2 = vcmp.gt.f32.partialorder %v3120_v53, 0.0  ;;  %1788 = vst.msk [vmem:[%s3383_s9 + $0x4c] sm:$0xf] %vm1768_vm0, %v1755_v46 }
 0x55c   :  { %v1703_v14 = vmul.f32 0.2, %v3123_v42  ;;  %v1730_v47 = vsel %vm1666_vm9, %v3111_v43, %v1698_v50  ;;  %v1759_v30 = vpack.c.bf16 %v1727_v54, %v1727_v54  ;;  %vm1671_vm3 = vcmp.gt.f32.partialorder %v3123_v42, 0.0  ;;  %1789 = vst.msk [vmem:[%s3383_s9 + $0x50] sm:$0xf] %vm1768_vm0, %v1756_v7 }
 0x55d   :  { %v1732_v8 = vsel %vm1668_vm10, %v3114_v61, %v1700_v29  ;;  %v1760_v63 = vpack.c.bf16 %v1728_v21, %v1728_v21  ;;  %v1699_v20 = vmul.f32 0.2, %v1635_v60  ;;  %v1733_v43 = vsel %vm1669_vm1, %v3117_v18, %v1701_v2  ;;  %1790 = vst.msk [vmem:[%s3383_s9 + $0x54] sm:$0xf] %vm1768_vm0, %v1757_v24 }
 0x55e   :  { %v1761_v51 = vpack.c.bf16 %v1729_v0, %v1729_v0  ;;  %vm1667_vm4 = vcmp.gt.f32.partialorder %v1635_v60, 0.0  ;;  %v1734_v23 = vsel %vm1670_vm2, %v3120_v53, %v1702_v28  ;;  %v1762_v35 = vpack.c.bf16 %v1730_v47, %v1730_v47  ;;  %1791 = vst.msk [vmem:[%s3383_s9 + $0x58] sm:$0xf] %vm1768_vm0, %v1758_v48 }
 0x55f   :  { %v1735_v61 = vsel %vm1671_vm3, %v3123_v42, %v1703_v14  ;;  %v1764_v17 = vpack.c.bf16 %v1732_v8, %v1732_v8  ;;  %1792 = vst.msk [vmem:[%s3383_s9 + $0x5c] sm:$0xf] %vm1768_vm0, %v1759_v30  ;;  %v1765_v18 = vpack.c.bf16 %v1733_v43, %v1733_v43  ;;  %v1731_v53 = vsel %vm1667_vm4, %v1635_v60, %v1699_v20 }
 0x560   :  { %1793 = vst.msk [vmem:[%s3383_s9 + $0x60] sm:$0xf] %vm1768_vm0, %v1760_v63  ;;  %v1766_v9 = vpack.c.bf16 %v1734_v23, %v1734_v23  ;;  %v1767_v42 = vpack.c.bf16 %v1735_v61, %v1735_v61  ;;  %v1763_v41 = vpack.c.bf16 %v1731_v53, %v1731_v53 }
 0x561   :  { %1794 = vst.msk [vmem:[%s3383_s9 + $0x64] sm:$0xf] %vm1768_vm0, %v1761_v51 }
 0x562   :  { %1795 = vst.msk [vmem:[%s3383_s9 + $0x68] sm:$0xf] %vm1768_vm0, %v1762_v35 }
 0x563   :  { %1797 = vst.msk [vmem:[%s3383_s9 + $0x70] sm:$0xf] %vm1768_vm0, %v1764_v17 }
 0x564   :  { %1798 = vst.msk [vmem:[%s3383_s9 + $0x74] sm:$0xf] %vm1768_vm0, %v1765_v18 }
 0x565   :  { %1799 = vst.msk [vmem:[%s3383_s9 + $0x78] sm:$0xf] %vm1768_vm0, %v1766_v9 }
 0x566   :  { %1800 = vst.msk [vmem:[%s3383_s9 + $0x7c] sm:$0xf] %vm1768_vm0, %v1767_v42 }
 0x567   :  { %1796 = vst.msk [vmem:[%s3383_s9 + $0x6c] sm:$0xf] %vm1768_vm0, %v1763_v41 }

</bundles_post_ra>
